<compile_context>
chip_gen: v5e
topology: v5e:2x2
jax: 0.10.0
libtpu: 0.0.40
codegen_flags: <defaults>
</compile_context>

<pallas_src>
import functools

import jax
import jax.numpy as jnp
from jax import lax
from jax.experimental import pallas as pl
from jax.experimental.pallas import tpu as pltpu


def inverted_residual_kernel(x_ref, p_ref, w3_ref, m_ref, out_ref, *, width):
    # x_ref block: (1, Cpad, L) with rows [0:Cin)=data, row Cin=ones, rest zeros.
    # out_ref block: (1, Cout, L). Pixels (and batch) sit on the lane axis.
    _, Cpad, L = x_ref.shape
    Chid = p_ref.shape[0]
    Cout = out_ref.shape[1]

    x_aug = x_ref[0].astype(jnp.float32)           # (Cpad, L)
    p = p_ref[...]                                 # (Chid, Cpad + 10) packed consts
    w1 = p[:, :Cpad]                               # expand conv (BN1 scale + b1 folded)
    wdw = p[:, Cpad:Cpad + 9]                      # depthwise taps (BN2 scale folded)
    b2 = p[:, Cpad + 9:Cpad + 10]                  # (Chid, 1)
    w3 = w3_ref[:, :Chid]                          # (8, Chid) project conv (rows>=Cout are 0)
    b3 = w3_ref[:, Chid:Chid + 1]                  # (8, 1)

    m = m_ref[...]                                 # (4, L) separable boundary masks
    col_pre = (m[0:1, :], None, m[1:2, :])         # source pre-masks for dx = -1, 0, +1
    row_out = (m[2:3, :], None, m[3:4, :])         # output row masks for dy = -1, 0, +1

    prec = lax.Precision.HIGHEST

    # ---- Stage 1: 1x1 expand conv + BN1 + ReLU6 on the MXU (bias via ones channel) --
    y1 = jnp.clip(jnp.dot(w1, x_aug, preferred_element_type=jnp.float32,
                          precision=prec), 0.0, 6.0)            # (Chid, L)

    # ---- Stage 2: 3x3 depthwise conv (stride 1, pad 1) + BN2 + ReLU6 ----------------
    # Tap (dy,dx) reads flat pixel p + dy*width + dx via a circular lane roll; zero
    # padding is emulated with separable masks (column mask pre-applied to the roll
    # source, row mask applied once per dy-group at the output).
    y1_dx = [y1 if cm is None else cm * y1 for cm in col_pre]
    acc2 = None
    for iy, dy in enumerate((-1, 0, 1)):
        part = None
        for ix, dx in enumerate((-1, 0, 1)):
            k = iy * 3 + ix
            tap = wdw[:, k:k + 1]                               # (Chid, 1)
            src = y1_dx[ix]
            off = dy * width + dx
            if off != 0:
                src = pltpu.roll(src, shift=(-off) % L, axis=1)
            term = tap * src
            part = term if part is None else part + term
        if row_out[iy] is not None:
            part = row_out[iy] * part
        acc2 = part if acc2 is None else acc2 + part
    y2 = jnp.clip(acc2 + b2, 0.0, 6.0)                          # (Chid, L)

    # ---- Stage 3: 1x1 project conv + BN3 on the MXU, residual add -------------------
    y3 = jnp.dot(w3, y2, preferred_element_type=jnp.float32, precision=prec) + b3
    out_ref[0] = (x_aug[:Cout, :] + y3[:Cout, :]).astype(out_ref.dtype)


def inverted_residual_pallas(x_steps, params, w3b, masks, *, width, cout):
    S, Cpad, L = x_steps.shape
    kernel = functools.partial(inverted_residual_kernel, width=width)
    const = lambda s: (0, 0)
    return pl.pallas_call(
        kernel,
        out_shape=jax.ShapeDtypeStruct((S, cout, L), x_steps.dtype),
        grid_spec=pltpu.PrefetchScalarGridSpec(
            num_scalar_prefetch=0,
            grid=(S,),
            in_specs=[
                pl.BlockSpec((1, Cpad, L), lambda s: (s, 0, 0)),
                pl.BlockSpec(params.shape, const),
                pl.BlockSpec(w3b.shape, const),
                pl.BlockSpec(masks.shape, const),
            ],
            out_specs=pl.BlockSpec((1, cout, L), lambda s: (s, 0, 0)),
        ),
        compiler_params=pltpu.CompilerParams(
            dimension_semantics=("parallel",)),
    )(x_steps, params, w3b, masks)


def bn_fold(gamma, beta, mean, var, eps=1e-5):
    scale = gamma / jnp.sqrt(var + eps)
    return scale, beta - mean * scale


def inverted_residual_forward(x_nchw, w1_oihw, bn1, wdw_oihw, bn2, w3_oihw, bn3,
                              *, num_steps=1):
    """Eval-mode forward of InvertedResidual(stride=1, inp==oup) via the Pallas kernel.

    num_steps: grid length; the batch is split into num_steps groups and each group's
    images are concatenated along the lane axis.  Use 1 on single-TC chips (v5e/v6e);
    use 2 on v7x so both TensorCores get a "parallel" grid step.
    """
    N, Cin, H, W = x_nchw.shape
    hidden = w1_oihw.shape[0]
    Cout = w3_oihw.shape[0]
    assert Cin == Cout, "residual path requires inp == oup (and stride == 1)"
    assert N % num_steps == 0
    Nb = N // num_steps
    HW, L = H * W, Nb * H * W
    Cpad = ((Cin + 1 + 7) // 8) * 8      # data channels + ones channel, padded to 8
    C8 = ((Cout + 7) // 8) * 8

    s1, b1 = bn_fold(*bn1)
    s2, b2 = bn_fold(*bn2)
    s3, b3 = bn_fold(*bn3)
    w1s = w1_oihw[:, :, 0, 0] * s1[:, None]                        # (hidden, Cin)
    wdw9 = wdw_oihw[:, 0].reshape(hidden, 9) * s2[:, None]         # (hidden, 9)
    w3s = w3_oihw[:, :, 0, 0] * s3[:, None]                        # (Cout, hidden)

    # Packed constants: params = [w1 | b1 | 0-pad | dw taps | b2], w3b = [w3 | b3].
    w1_aug = jnp.zeros((hidden, Cpad), jnp.float32)
    w1_aug = w1_aug.at[:, :Cin].set(w1s).at[:, Cin].set(b1)
    params = jnp.concatenate([w1_aug, wdw9, b2[:, None]], axis=1)  # (hidden, Cpad+10)
    w3b = jnp.zeros((C8, hidden + 1), jnp.float32)
    w3b = w3b.at[:Cout, :hidden].set(w3s).at[:Cout, hidden].set(b3)

    # x laid out (num_steps, Cpad, Nb*HW): batch+pixels lane-dense, row Cin = ones.
    x_grp = x_nchw.reshape(num_steps, Nb, Cin, HW).transpose(0, 2, 1, 3)
    x_grp = x_grp.reshape(num_steps, Cin, L)
    x_steps = jnp.zeros((num_steps, Cpad, L), x_nchw.dtype)
    x_steps = x_steps.at[:, :Cin, :].set(x_grp).at[:, Cin, :].set(1.0)

    # Separable zero-padding masks on the flattened (batch-concatenated) pixel axis.
    pix = jnp.arange(L) % HW
    h_idx, w_idx = pix // W, pix % W
    masks = jnp.stack([
        (w_idx <= W - 2).astype(jnp.float32),   # column pre-mask for dx = -1 taps
        (w_idx >= 1).astype(jnp.float32),       # column pre-mask for dx = +1 taps
        (h_idx >= 1).astype(jnp.float32),       # row mask for dy = -1 taps
        (h_idx <= H - 2).astype(jnp.float32),   # row mask for dy = +1 taps
    ], axis=0)                                  # (4, L)

    out = inverted_residual_pallas(x_steps, params, w3b, masks, width=W, cout=Cout)
    out = out.reshape(num_steps, Cout, Nb, HW).transpose(0, 2, 1, 3)
    return out.reshape(N, Cout, H, W)


def reference_nchw(x, w1_oihw, bn1, wdw_oihw, bn2, w3_oihw, bn3):
    """Pure-JAX/XLA reference mirroring the PyTorch module (eval-mode BN)."""
    def bn(y, params):
        gamma, beta, mean, var = params
        s = gamma / jnp.sqrt(var + 1e-5)
        b = beta - mean * s
        return y * s[None, :, None, None] + b[None, :, None, None]

    dn = ("NCHW", "OIHW", "NCHW")
    prec = lax.Precision.HIGHEST
    y = lax.conv_general_dilated(x, w1_oihw, (1, 1), "VALID",
                                 dimension_numbers=dn, precision=prec)
    y = jnp.clip(bn(y, bn1), 0.0, 6.0)
    hidden = wdw_oihw.shape[0]
    y = lax.conv_general_dilated(y, wdw_oihw, (1, 1), ((1, 1), (1, 1)),
                                 dimension_numbers=dn, feature_group_count=hidden,
                                 precision=prec)
    y = jnp.clip(bn(y, bn2), 0.0, 6.0)
    y = lax.conv_general_dilated(y, w3_oihw, (1, 1), "VALID",
                                 dimension_numbers=dn, precision=prec)
    y = bn(y, bn3)
    return x + y


if __name__ == "__main__":
    # Module config: InvertedResidual(inp=4, oup=4, stride=1, expand_ratio=6)
    N, Cin, H, W = 2, 4, 16, 16
    expand_ratio, Cout = 6, 4
    hidden = Cin * expand_ratio  # 24

    key = jax.random.PRNGKey(0)
    keys = jax.random.split(key, 8)

    x_nchw = jax.random.normal(keys[0], (N, Cin, H, W), jnp.float32)
    w1_oihw = 0.2 * jax.random.normal(keys[1], (hidden, Cin, 1, 1), jnp.float32)
    wdw_oihw = 0.2 * jax.random.normal(keys[2], (hidden, 1, 3, 3), jnp.float32)
    w3_oihw = 0.2 * jax.random.normal(keys[3], (Cout, hidden, 1, 1), jnp.float32)

    def bn_params(k, c):
        k1, k2, k3, k4 = jax.random.split(k, 4)
        return (1.0 + 0.1 * jax.random.normal(k1, (c,), jnp.float32),
                0.1 * jax.random.normal(k2, (c,), jnp.float32),
                0.1 * jax.random.normal(k3, (c,), jnp.float32),
                1.0 + 0.1 * jax.random.uniform(k4, (c,), jnp.float32))

    bn1 = bn_params(keys[4], hidden)
    bn2 = bn_params(keys[5], hidden)
    bn3 = bn_params(keys[6], Cout)

    # Fully fused batch (single grid step) -- best on single-TC v5e/v6e.
    # On v7x pass num_steps=2 so both TensorCores get a parallel step.
    out = inverted_residual_forward(x_nchw, w1_oihw, bn1, wdw_oihw, bn2,
                                    w3_oihw, bn3, num_steps=1)
    out = jax.block_until_ready(out)

    ref = jax.block_until_ready(
        reference_nchw(x_nchw, w1_oihw, bn1, wdw_oihw, bn2, w3_oihw, bn3))

    assert out.shape == (N, Cout, H, W)
    max_err = float(jnp.max(jnp.abs(out - ref)))
    assert jnp.allclose(out, ref, rtol=1e-3, atol=1e-3), max_err

    print("KERNEL_OK")
</pallas_src>

<mosaic_0001>
module attributes {stable_mosaic.version = 11 : i64} {
  func.func @inverted_residual_kernel(%arg0: i32, %arg1: memref<1x8x512xf32, #tpu.memory_space<vmem>>, %arg2: memref<24x18xf32, #tpu.memory_space<vmem>>, %arg3: memref<8x25xf32, #tpu.memory_space<vmem>>, %arg4: memref<4x512xf32, #tpu.memory_space<vmem>>, %arg5: memref<1x4x512xf32, #tpu.memory_space<vmem>>) attributes {dimension_semantics = [#tpu.dimension_semantics<parallel>], iteration_bounds = array<i64: 1>, scalar_prefetch = 0 : i64, scratch_operands = 0 : i64, tpu.core_type = #tpu.core_type<tc>, window_params = [{transform_indices = @transform_0, window_bounds = array<i64: 1, 8, 512>}, {pipeline_mode = #tpu.pipeline_mode<synchronous>, transform_indices = @transform_1, window_bounds = array<i64: 24, 18>}, {pipeline_mode = #tpu.pipeline_mode<synchronous>, transform_indices = @transform_2, window_bounds = array<i64: 8, 25>}, {pipeline_mode = #tpu.pipeline_mode<synchronous>, transform_indices = @transform_3, window_bounds = array<i64: 4, 512>}, {transform_indices = @transform_4, window_bounds = array<i64: 1, 4, 512>}]} {
    %c0 = arith.constant 0 : index
    %c0_0 = arith.constant 0 : index
    %c0_1 = arith.constant 0 : index
    %0 = vector.load %arg1[%c0, %c0_0, %c0_1] : memref<1x8x512xf32, #tpu.memory_space<vmem>>, vector<1x8x512xf32>
    %1 = vector.shape_cast %0 : vector<1x8x512xf32> to vector<8x512xf32>
    %c0_2 = arith.constant 0 : index
    %c0_3 = arith.constant 0 : index
    %2 = vector.load %arg2[%c0_2, %c0_3] : memref<24x18xf32, #tpu.memory_space<vmem>>, vector<24x18xf32>
    %3 = vector.extract_strided_slice %2 {offsets = [0, 0], sizes = [24, 8], strides = [1, 1]} : vector<24x18xf32> to vector<24x8xf32>
    %4 = vector.extract_strided_slice %2 {offsets = [0, 8], sizes = [24, 9], strides = [1, 1]} : vector<24x18xf32> to vector<24x9xf32>
    %5 = vector.extract_strided_slice %2 {offsets = [0, 17], sizes = [24, 1], strides = [1, 1]} : vector<24x18xf32> to vector<24x1xf32>
    %c0_4 = arith.constant 0 : index
    %c0_5 = arith.constant 0 : index
    %6 = vector.load %arg3[%c0_4, %c0_5] : memref<8x25xf32, #tpu.memory_space<vmem>>, vector<8x24xf32>
    %c0_6 = arith.constant 0 : index
    %c24 = arith.constant 24 : index
    %7 = vector.load %arg3[%c0_6, %c24] : memref<8x25xf32, #tpu.memory_space<vmem>>, vector<8x1xf32>
    %c0_7 = arith.constant 0 : index
    %c0_8 = arith.constant 0 : index
    %8 = vector.load %arg4[%c0_7, %c0_8] : memref<4x512xf32, #tpu.memory_space<vmem>>, vector<4x512xf32>
    %9 = vector.extract_strided_slice %8 {offsets = [0, 0], sizes = [1, 512], strides = [1, 1]} : vector<4x512xf32> to vector<1x512xf32>
    %10 = vector.extract_strided_slice %8 {offsets = [1, 0], sizes = [1, 512], strides = [1, 1]} : vector<4x512xf32> to vector<1x512xf32>
    %11 = vector.extract_strided_slice %8 {offsets = [2, 0], sizes = [1, 512], strides = [1, 1]} : vector<4x512xf32> to vector<1x512xf32>
    %12 = vector.extract_strided_slice %8 {offsets = [3, 0], sizes = [1, 512], strides = [1, 1]} : vector<4x512xf32> to vector<1x512xf32>
    %cst = arith.constant dense<0.000000e+00> : vector<24x512xf32>
    %13 = tpu.matmul %3, %1, %cst {dimension_numbers = #tpu.dot_dimension_numbers<[1], [0], [0], [1], [0, 0, 1, 1], [], []>, precision = #tpu.contract_precision<fp32>} : vector<24x8xf32>, vector<8x512xf32>, vector<24x512xf32> -> vector<24x512xf32>
    %cst_9 = arith.constant 0.000000e+00 : f32
    %cst_10 = arith.constant 6.000000e+00 : f32
    %14 = vector.broadcast %cst_9 : f32 to vector<24x512xf32>
    %15 = arith.maximumf %14, %13 : vector<24x512xf32>
    %16 = vector.broadcast %cst_10 : f32 to vector<24x512xf32>
    %17 = arith.minimumf %16, %15 : vector<24x512xf32>
    %18 = vector.broadcast %9 : vector<1x512xf32> to vector<24x512xf32>
    %19 = arith.mulf %18, %17 : vector<24x512xf32>
    %20 = vector.broadcast %10 : vector<1x512xf32> to vector<24x512xf32>
    %21 = arith.mulf %20, %17 : vector<24x512xf32>
    %22 = vector.extract_strided_slice %4 {offsets = [0, 0], sizes = [24, 1], strides = [1, 1]} : vector<24x9xf32> to vector<24x1xf32>
    %c17_i32 = arith.constant 17 : i32
    %23 = tpu.dynamic_rotate %19 by %c17_i32 dim 1 : vector<24x512xf32>, i32 -> vector<24x512xf32>
    %24 = vector.broadcast %22 : vector<24x1xf32> to vector<24x512xf32>
    %25 = arith.mulf %24, %23 : vector<24x512xf32>
    %26 = vector.extract_strided_slice %4 {offsets = [0, 1], sizes = [24, 1], strides = [1, 1]} : vector<24x9xf32> to vector<24x1xf32>
    %c16_i32 = arith.constant 16 : i32
    %27 = tpu.dynamic_rotate %17 by %c16_i32 dim 1 : vector<24x512xf32>, i32 -> vector<24x512xf32>
    %28 = vector.broadcast %26 : vector<24x1xf32> to vector<24x512xf32>
    %29 = arith.mulf %28, %27 : vector<24x512xf32>
    %30 = arith.addf %25, %29 : vector<24x512xf32>
    %31 = vector.extract_strided_slice %4 {offsets = [0, 2], sizes = [24, 1], strides = [1, 1]} : vector<24x9xf32> to vector<24x1xf32>
    %c15_i32 = arith.constant 15 : i32
    %32 = tpu.dynamic_rotate %21 by %c15_i32 dim 1 : vector<24x512xf32>, i32 -> vector<24x512xf32>
    %33 = vector.broadcast %31 : vector<24x1xf32> to vector<24x512xf32>
    %34 = arith.mulf %33, %32 : vector<24x512xf32>
    %35 = arith.addf %30, %34 : vector<24x512xf32>
    %36 = vector.broadcast %11 : vector<1x512xf32> to vector<24x512xf32>
    %37 = arith.mulf %36, %35 : vector<24x512xf32>
    %38 = vector.extract_strided_slice %4 {offsets = [0, 3], sizes = [24, 1], strides = [1, 1]} : vector<24x9xf32> to vector<24x1xf32>
    %c1_i32 = arith.constant 1 : i32
    %39 = tpu.dynamic_rotate %19 by %c1_i32 dim 1 : vector<24x512xf32>, i32 -> vector<24x512xf32>
    %40 = vector.broadcast %38 : vector<24x1xf32> to vector<24x512xf32>
    %41 = arith.mulf %40, %39 : vector<24x512xf32>
    %42 = vector.extract_strided_slice %4 {offsets = [0, 4], sizes = [24, 1], strides = [1, 1]} : vector<24x9xf32> to vector<24x1xf32>
    %43 = vector.broadcast %42 : vector<24x1xf32> to vector<24x512xf32>
    %44 = arith.mulf %43, %17 : vector<24x512xf32>
    %45 = arith.addf %41, %44 : vector<24x512xf32>
    %46 = vector.extract_strided_slice %4 {offsets = [0, 5], sizes = [24, 1], strides = [1, 1]} : vector<24x9xf32> to vector<24x1xf32>
    %c511_i32 = arith.constant 511 : i32
    %47 = tpu.dynamic_rotate %21 by %c511_i32 dim 1 : vector<24x512xf32>, i32 -> vector<24x512xf32>
    %48 = vector.broadcast %46 : vector<24x1xf32> to vector<24x512xf32>
    %49 = arith.mulf %48, %47 : vector<24x512xf32>
    %50 = arith.addf %45, %49 : vector<24x512xf32>
    %51 = arith.addf %37, %50 : vector<24x512xf32>
    %52 = vector.extract_strided_slice %4 {offsets = [0, 6], sizes = [24, 1], strides = [1, 1]} : vector<24x9xf32> to vector<24x1xf32>
    %c497_i32 = arith.constant 497 : i32
    %53 = tpu.dynamic_rotate %19 by %c497_i32 dim 1 : vector<24x512xf32>, i32 -> vector<24x512xf32>
    %54 = vector.broadcast %52 : vector<24x1xf32> to vector<24x512xf32>
    %55 = arith.mulf %54, %53 : vector<24x512xf32>
    %56 = vector.extract_strided_slice %4 {offsets = [0, 7], sizes = [24, 1], strides = [1, 1]} : vector<24x9xf32> to vector<24x1xf32>
    %c496_i32 = arith.constant 496 : i32
    %57 = tpu.dynamic_rotate %17 by %c496_i32 dim 1 : vector<24x512xf32>, i32 -> vector<24x512xf32>
    %58 = vector.broadcast %56 : vector<24x1xf32> to vector<24x512xf32>
    %59 = arith.mulf %58, %57 : vector<24x512xf32>
    %60 = arith.addf %55, %59 : vector<24x512xf32>
    %61 = vector.extract_strided_slice %4 {offsets = [0, 8], sizes = [24, 1], strides = [1, 1]} : vector<24x9xf32> to vector<24x1xf32>
    %c495_i32 = arith.constant 495 : i32
    %62 = tpu.dynamic_rotate %21 by %c495_i32 dim 1 : vector<24x512xf32>, i32 -> vector<24x512xf32>
    %63 = vector.broadcast %61 : vector<24x1xf32> to vector<24x512xf32>
    %64 = arith.mulf %63, %62 : vector<24x512xf32>
    %65 = arith.addf %60, %64 : vector<24x512xf32>
    %66 = vector.broadcast %12 : vector<1x512xf32> to vector<24x512xf32>
    %67 = arith.mulf %66, %65 : vector<24x512xf32>
    %68 = arith.addf %51, %67 : vector<24x512xf32>
    %69 = vector.broadcast %5 : vector<24x1xf32> to vector<24x512xf32>
    %70 = arith.addf %68, %69 : vector<24x512xf32>
    %cst_11 = arith.constant 0.000000e+00 : f32
    %cst_12 = arith.constant 6.000000e+00 : f32
    %71 = vector.broadcast %cst_11 : f32 to vector<24x512xf32>
    %72 = arith.maximumf %71, %70 : vector<24x512xf32>
    %73 = vector.broadcast %cst_12 : f32 to vector<24x512xf32>
    %74 = arith.minimumf %73, %72 : vector<24x512xf32>
    %cst_13 = arith.constant dense<0.000000e+00> : vector<8x512xf32>
    %75 = tpu.matmul %6, %74, %cst_13 {dimension_numbers = #tpu.dot_dimension_numbers<[1], [0], [0], [1], [0, 0, 1, 1], [], []>, precision = #tpu.contract_precision<fp32>} : vector<8x24xf32>, vector<24x512xf32>, vector<8x512xf32> -> vector<8x512xf32>
    %76 = vector.broadcast %7 : vector<8x1xf32> to vector<8x512xf32>
    %77 = arith.addf %75, %76 : vector<8x512xf32>
    %78 = vector.extract_strided_slice %1 {offsets = [0, 0], sizes = [4, 512], strides = [1, 1]} : vector<8x512xf32> to vector<4x512xf32>
    %79 = vector.extract_strided_slice %77 {offsets = [0, 0], sizes = [4, 512], strides = [1, 1]} : vector<8x512xf32> to vector<4x512xf32>
    %80 = arith.addf %78, %79 : vector<4x512xf32>
    %c0_14 = arith.constant 0 : index
    %c0_15 = arith.constant 0 : index
    %c0_16 = arith.constant 0 : index
    %81 = vector.load %arg5[%c0_14, %c0_15, %c0_16] : memref<1x4x512xf32, #tpu.memory_space<vmem>>, vector<1x4x512xf32>
    %82 = vector.shape_cast %81 : vector<1x4x512xf32> to vector<4x512xf32>
    %83 = vector.shape_cast %80 : vector<4x512xf32> to vector<1x4x512xf32>
    tpu.vector_store %arg5[%c0_14, %c0_15, %c0_16], %83 {strides = array<i32>} : memref<1x4x512xf32, #tpu.memory_space<vmem>>, vector<1x4x512xf32>,
    return
  }
  func.func @transform_0(%arg0: i32) -> (i32, i32, i32) {
    %c0_i32 = arith.constant 0 : i32
    %c0_i32_0 = arith.constant 0 : i32
    %c0_i32_1 = arith.constant 0 : i32
    return %arg0, %c0_i32, %c0_i32_0 : i32, i32, i32
  }
  func.func @transform_1(%arg0: i32) -> (i32, i32) {
    %c0_i32 = arith.constant 0 : i32
    %c0_i32_0 = arith.constant 0 : i32
    %c0_i32_1 = arith.constant 0 : i32
    return %c0_i32, %c0_i32_0 : i32, i32
  }
  func.func @transform_2(%arg0: i32) -> (i32, i32) {
    %c0_i32 = arith.constant 0 : i32
    %c0_i32_0 = arith.constant 0 : i32
    %c0_i32_1 = arith.constant 0 : i32
    return %c0_i32, %c0_i32_0 : i32, i32
  }
  func.func @transform_3(%arg0: i32) -> (i32, i32) {
    %c0_i32 = arith.constant 0 : i32
    %c0_i32_0 = arith.constant 0 : i32
    %c0_i32_1 = arith.constant 0 : i32
    return %c0_i32, %c0_i32_0 : i32, i32
  }
  func.func @transform_4(%arg0: i32) -> (i32, i32, i32) {
    %c0_i32 = arith.constant 0 : i32
    %c0_i32_0 = arith.constant 0 : i32
    %c0_i32_1 = arith.constant 0 : i32
    return %arg0, %c0_i32, %c0_i32_0 : i32, i32, i32
  }
}

</mosaic_0001>

<bundles_post_ra>
// kernel: tpu_custom_call.1
= control target key start
LH: loop header
LB: loop body
LE: loop exit
PB: predicated region body
PF: predicated region fallthrough
CT: control target
= control target key end

     0   :  { %9 = vsyncpa [#allocation3], 0  ;;  %s4070_s0 = inlined_call_operand.hbm [shape: f32[1,8,512], index: 0, kind: input, shape index: {}]   ;;  %s4071_s1 = inlined_call_operand.hbm [shape: f32[24,18], index: 1, kind: input, shape index: {}]   ;;  %s4072_s2 = inlined_call_operand.hbm [shape: f32[8,25], index: 2, kind: input, shape index: {}]   ;;  %s4073_s3 = inlined_call_operand.hbm [shape: f32[4,512], index: 3, kind: input, shape index: {}]   ;;  %s4074_s4 = inlined_call_operand.hbm [shape: f32[1,4,512], index: 4, kind: output, shape index: {}]  }
   0x1   :  { %10 = vsyncpa [#allocation6], 0 }
   0x2   :  { %11 = vsyncpa [#allocation9], 0  ;;  %s28_s17 = sshll.u32 %s4071_s1, 4  ;;  %s29_s17 = int_to_ptr.hbm [resolvable:$true] %s28_s17 }
   0x3   :  { %12 = vsyncpa [#allocation4], 0  ;;  %s2626_s18 = smov [#allocation5]   ;;  %s18_s22 = sshll.u32 %s4070_s0, 4  ;;  %s19_s22 = int_to_ptr.hbm [resolvable:$true] %s18_s22 }
   0x4   :  { %s30_s19 = sshll.u32 %s2626_s18, 4  ;;  %s2627_s23 = smov 128   ;;  %s31_s19 = int_to_ptr.vmem [resolvable:$true] %s30_s19 }
   0x5   :  { %s2628_s24 = smov 8   ;;  %s2629_s25 = smov [#allocation2]  }
   0x6   :  { %36 = dma.hbm_to_vmem [thread:$0]  %s29_s17, 384, %s31_s19, [#allocation6], %s2627_s23, %s2627_s23, %s2628_s24  }
   0x7   :  { %s20_s26 = sshll.u32 %s2629_s25, 4  ;;  %s42_s29 = sshll.u32 %s4072_s2, 4  ;;  %s21_s26 = int_to_ptr.vmem [resolvable:$true] %s20_s26  ;;  %s43_s29 = int_to_ptr.hbm [resolvable:$true] %s42_s29 }
   0x8   :  { %23 = dma.hbm_to_vmem [thread:$0]  %s19_s22, 512, %s21_s26, [#allocation3]  }
   0x9   :  { %s53_s5 = sshll.u32 %s4073_s3, 4  ;;  %s2630_s6 = smov [#allocation7]   ;;  %s54_s5 = int_to_ptr.hbm [resolvable:$true] %s53_s5 }
   0xa   :  { %s44_s7 = sshll.u32 %s2630_s6, 4  ;;  %s2631_s0 = smov [#allocation8]   ;;  %s45_s7 = int_to_ptr.vmem [resolvable:$true] %s44_s7 }
   0xb   :  { %47 = dma.hbm_to_vmem [thread:$0]  %s43_s29, 128, %s45_s7, [#allocation6]  }
   0xc   :  { %s55_s8 = sshll.u32 %s2631_s0, 4  ;;  %s56_s8 = int_to_ptr.vmem [resolvable:$true] %s55_s8 }
   0xd   :  { %58 = dma.hbm_to_vmem [thread:$0]  %s54_s5, 256, %s56_s8, [#allocation9]  }
   0xe   :  { %2618 = dma.done.wait [#allocation3], 512  }
   0xf   :  { %2619 = vsyncadd [#allocation3], 4294966784 }
  0x10   :  { %2620 = dma.done.wait [#allocation6], 512  }
  0x11   :  { %2621 = vsyncadd [#allocation6], 4294966784 }
  0x12   :  { %2622 = dma.done.wait [#allocation9], 256  }
  0x13   :  { %2623 = vsyncadd [#allocation9], 4294967040  ;;  %v2632_v0 = vmov 8   ;;  %vm85_vm0 = vcmask 64512   ;;  %v75_v1 = vld [vmem:[#allocation2] sm:$0xff]  ;;  %v2691_v3 = vld [vmem:[#allocation5 + $0x8] sm:$0xff] }
  0x14   :  { %2466 = vset.pattern.permute.xlu1 %v2632_v0  ;;  %2467 = vset.pattern.permute.xlu2 %v2632_v0  ;;  %v2689_v2 = vld [vmem:[#allocation5] sm:$0xff]  ;;  %v110_v4 = vand.u32 4294901760, %v75_v1  ;;  %v90_v6 = vsel %vm85_vm0, %v2691_v3, 0  ;;  %v2698_v7 = vld [vmem:[#allocation5 + $0x10] sm:$0xff]  ;;  %v76_v8 = vld [vmem:[#allocation2 + $0x8] sm:$0xff]  ;;  %v2633_v26 = vmov 9  }
  0x15   :  { %2465 = vset.pattern.permute.xlu0 %v2632_v0  ;;  %v87_v5 = vsel %vm85_vm0, %v2689_v2, 0  ;;  %1045 = vperm.xlu1 %2466, %v2691_v3   ;;  %v2703_v10 = vand.u32 4294901760, %v90_v6  ;;  %v318_v11 = vand.u32 4294901760, %v76_v8  ;;  %v93_v17 = vsel %vm85_vm0, %v2698_v7, 0  ;;  %v77_v38 = vld [vmem:[#allocation2 + $0x10] sm:$0xff]  ;;  %v78_v44 = vld [vmem:[#allocation2 + $0x18] sm:$0xff] }
  0x16   :  { %1041 = vperm.xlu0 %2465, %v2689_v2   ;;  %v2701_v9 = vand.u32 4294901760, %v87_v5  ;;  %1049 = vperm.xlu2 %2467, %v2698_v7   ;;  %v153_v12 = vsub.f32 %v75_v1, %v110_v4  ;;  %v2724_v23 = vand.u32 4294901760, %v93_v17  ;;  %v2634_v33 = vmov 10   ;;  %v2835_v1 = vld [vmem:[#allocation8] sm:$0xff]  ;;  %s2641_s2 = smov 112   ;;  %s2642_s3 = smov 16  }
  0x17   :  { %221 = vmatpush.msra.mxu3 %v110_v4  ;;  %111 = vmatpush.msra.mxu0 %v110_v4  ;;  %v2710_v14 = vsub.f32 %v90_v6, %v2703_v10  ;;  %v361_v15 = vsub.f32 %v76_v8, %v318_v11  ;;  %v2635_v36 = vmov 11   ;;  %v2636_v37 = vmov 12   ;;  %s2643_s9 = smov 1   ;;  %s2644_s10 = smov 15  }
  0x18   :  { %v2707_v13 = vsub.f32 %v87_v5, %v2701_v9  ;;  %188 = vmatpush.msra.mxu2 %v153_v12  ;;  %v154_v16 = vand.u32 4294901760, %v153_v12  ;;  %v2735_v30 = vsub.f32 %v93_v17, %v2724_v23  ;;  %v526_v39 = vand.u32 4294901760, %v77_v38  ;;  %s2645_s11 = smov 17   ;;  %s2646_s12 = smov 127  }
  0x19   :  { %v362_v19 = vand.u32 4294901760, %v361_v15  ;;  %v2722_v22 = vand.u32 4294901760, %v2710_v14  ;;  %v734_v45 = vand.u32 4294901760, %v78_v44  ;;  %v2637_v50 = vmov 13   ;;  %s2647_s13 = smov 113   ;;  %s2648_s14 = smov 111  }
  0x1a   :  { %191 = vmatmul.f32.vlgmr.msra.gmra.mxu2 %v2707_v13  ;;  %v2716_v18 = vand.u32 4294901760, %v2707_v13  ;;  %v155_v20 = vsub.f32 %v153_v12, %v154_v16  ;;  %259 = vmatpush.msrb.mxu0 %v154_v16  ;;  %v2742_v32 = vand.u32 4294901760, %v2735_v30  ;;  %v569_v40 = vsub.f32 %v77_v38, %v526_v39  ;;  %s2651_s15 = smov [#allocation10]   ;;  %s2427_s19 = sshll.u32 %s4074_s4, 4  ;;  %s2428_s19 = int_to_ptr.hbm [resolvable:$true] %s2427_s19 }
  0x1b   :  { %319 = vmatpush.msrb.mxu2 %v318_v11  ;;  %v363_v24 = vsub.f32 %v361_v15, %v362_v19  ;;  %v123_v29 = vsub.f32 %v2710_v14, %v2722_v22  ;;  %v777_v46 = vsub.f32 %v78_v44, %v734_v45  ;;  %v2638_v51 = vmov 14   ;;  %s2425_s16 = sshll.u32 %s2651_s15, 4  ;;  %s2426_s16 = int_to_ptr.vmem [resolvable:$true] %s2425_s16 }
  0x1c   :  { %225 = vmatmul.f32.vlgmr.msra.gmra.mxu3 %v2716_v18  ;;  %v115_v21 = vsub.f32 %v2707_v13, %v2716_v18  ;;  %v156_v25 = vand.u32 4294901760, %v155_v20  ;;  %v131_v34 = vsub.f32 %v2735_v30, %v2742_v32  ;;  %v570_v41 = vand.u32 4294901760, %v569_v40 }
  0x1d   :  { %467 = vmatpush.msra.mxu2 %v362_v19  ;;  %2468 = vset.pattern.permute.xlu1 %v2633_v26  ;;  %v364_v28 = vand.u32 4294901760, %v363_v24  ;;  %v2739_v31 = vand.u32 4294901760, %v123_v29  ;;  %v778_v47 = vand.u32 4294901760, %v777_v46  ;;  %v2639_v52 = vmov 16  }
  0x1e   :  { %2470 = vset.pattern.permute.xlu0 %v2633_v26  ;;  %v2726_v27 = vand.u32 4294901760, %v115_v21  ;;  %1102 = vperm.xlu1 %2468, %v2689_v2   ;;  %v2753_v35 = vand.u32 4294901760, %v131_v34  ;;  %v571_v42 = vsub.f32 %v569_v40, %v570_v41  ;;  %v2640_v53 = vmov 15  }
  0x1f   :  { %2469 = vset.pattern.permute.xlu2 %v2633_v26  ;;  %157 = vmatpush.msra.mxu1 %v156_v25  ;;  %v779_v48 = vsub.f32 %v777_v46, %v778_v47  ;;  %vm1712_vm9 = vcmask 195584   ;;  %vm2413_vm10 = vcmask 1043456  }
  0x20   :  { %1106 = vperm.xlu2 %2469, %v2691_v3   ;;  %117 = vmatmul.f32.vlgmr.msra.gmra.mxu0 %v2726_v27  ;;  %v572_v43 = vand.u32 4294901760, %v571_v42 }
  0x21   :  { %159 = vmatmul.f32.vlgmr.msra.gmra.mxu1 %v2701_v9  ;;  %365 = vmatpush.msrb.mxu3 %v364_v28  ;;  %v780_v49 = vand.u32 4294901760, %v779_v48 }
  0x22   :  { %289 = vmatpush.msrb.mxu1 %v110_v4  ;;  %196 = vmatmul.f32.gmra.mxu2 %v2710_v14 }
  0x23   :  { %396 = vmatpush.msra.mxu0 %v361_v15  ;;  %497 = vmatpush.msra.mxu3 %v318_v11  ;;  %v977_v15 = vperm.slane %v2835_v1, 1 }
  0x24   :  { %429 = vmatpush.msra.mxu1 %v318_v11  ;;  %231 = vmatmul.f32.gmra.mxu3 %v2722_v22 }
  0x25   :  { %1110 = vperm.xlu0 %2470, %v2698_v7   ;;  %v2850_v20 = vperm.slane %v977_v15, 1 }
  0x26   :  { %2473 = vset.pattern.permute.xlu1 %v2634_v33 }
  0x27   :  { %1183 = vperm.xlu1 %2473, %v2698_v7  }
  0x28   :  { %2471 = vset.pattern.permute.xlu2 %v2634_v33  ;;  %125 = vmatmul.f32.gmra.mxu0 %v2739_v31 }
  0x29   :  { %163 = vmatmul.f32.gmra.mxu1 %v2703_v10  ;;  %1175 = vperm.xlu2 %2471, %v2689_v2  }
  0x2a   :  { %201 = vmatmul.f32.gmra.mxu2 %v2735_v30 }
  0x2c   :  { %237 = vmatmul.f32.gmra.mxu3 %v2742_v32 }
  0x2d   :  { %2472 = vset.pattern.permute.xlu0 %v2634_v33 }
  0x2e   :  { %1179 = vperm.xlu0 %2472, %v2691_v3  }
  0x2f   :  { %2475 = vset.pattern.permute.xlu1 %v2635_v36 }
  0x30   :  { %133 = vmatmul.f32.gmra.mxu0 %v2753_v35  ;;  %1276 = vperm.xlu1 %2475, %v2691_v3  }
  0x31   :  { %167 = vmatmul.f32.gmra.mxu1 %v2724_v23  ;;  %2476 = vset.pattern.permute.xlu2 %v2635_v36 }
  0x32   :  { %325 = vmatmul.f32.vlgmr.msrb.gmra.mxu2 %v2726_v27  ;;  %1280 = vperm.xlu2 %2476, %v2698_v7  }
  0x33   :  { %604 = vmatpush.msrb.mxu2 %v569_v40 }
  0x34   :  { %367 = vmatmul.f32.vlgmr.msrb.gmra.mxu3 %v2701_v9 }
  0x35   :  { %637 = vmatpush.msrb.mxu3 %v526_v39 }
  0x36   :  { %2474 = vset.pattern.permute.xlu0 %v2635_v36 }
  0x37   :  { %1272 = vperm.xlu0 %2474, %v2689_v2  }
  0x38   :  { %261 = vmatmul.f32.vlgmr.msrb.gmra.mxu0 %v2701_v9  ;;  %2477 = vset.pattern.permute.xlu1 %v2636_v37 }
  0x39   :  { %291 = vmatmul.f32.vlgmr.msrb.gmra.mxu1 %v2701_v9  ;;  %1296 = vperm.xlu1 %2477, %v2689_v2  }
  0x3a   :  { %333 = vmatmul.f32.gmra.mxu2 %v2739_v31  ;;  %2478 = vset.pattern.permute.xlu2 %v2636_v37 }
  0x3b   :  { %1300 = vperm.xlu2 %2478, %v2691_v3   ;;  %527 = vmatpush.msrb.mxu0 %v526_v39 }
  0x3c   :  { %371 = vmatmul.f32.gmra.mxu3 %v2703_v10  ;;  %573 = vmatpush.msrb.mxu1 %v572_v43 }
  0x3f   :  { %2480 = vset.pattern.permute.xlu0 %v2640_v53 }
  0x40   :  { %265 = vmatmul.f32.gmra.mxu0 %v2703_v10  ;;  %1523 = vperm.xlu0 %2480, %v2698_v7  }
  0x41   :  { %295 = vmatmul.f32.gmra.mxu1 %v2703_v10  ;;  %1304 = vperm.xlu1 %2477, %v2698_v7  }
  0x42   :  { %341 = vmatmul.f32.gmra.mxu2 %v2753_v35 }
  0x43   :  { %2479 = vset.pattern.permute.xlu2 %v2638_v51 }
  0x44   :  { %375 = vmatmul.f32.gmra.mxu3 %v2724_v23  ;;  %1462 = vperm.xlu2 %2479, %v2698_v7  }
  0x48   :  { %269 = vmatmul.f32.gmra.mxu0 %v2724_v23  ;;  %1519 = vperm.xlu0 %2480, %v2691_v3  }
  0x49   :  { %299 = vmatmul.f32.gmra.mxu1 %v2724_v23  ;;  %2481 = vset.pattern.permute.xlu1 %v2637_v50 }
  0x4a   :  { %469 = vmatmul.f32.vlgmr.msra.gmra.mxu2 %v2701_v9  ;;  %1377 = vperm.xlu1 %2481, %v2698_v7  }
  0x4b   :  { %735 = vmatpush.msra.mxu2 %v734_v45 }
  0x4c   :  { %499 = vmatmul.f32.vlgmr.msra.gmra.mxu3 %v2701_v9  ;;  %1458 = vperm.xlu2 %2479, %v2691_v3  }
  0x4d   :  { %781 = vmatpush.msra.mxu3 %v780_v49 }
  0x50   :  { %399 = vmatmul.f32.vlgmr.msra.gmra.mxu0 %v2707_v13  ;;  %1515 = vperm.xlu0 %2480, %v2689_v2  }
  0x51   :  { %433 = vmatmul.f32.vlgmr.msra.gmra.mxu1 %v2716_v18  ;;  %675 = vmatpush.msra.mxu0 %v570_v41 }
  0x52   :  { %705 = vmatpush.msra.mxu1 %v526_v39  ;;  %473 = vmatmul.f32.gmra.mxu2 %v2703_v10 }
  0x53   :  { %2482 = vset.pattern.permute.xlu1 %v2639_v52 }
  0x54   :  { %503 = vmatmul.f32.gmra.mxu3 %v2703_v10  ;;  %1596 = vperm.xlu1 %2482, %v2698_v7   ;;  %v953_v7 = vperm.slane %v2835_v1, 0 }
  0x55   :  { %1454 = vperm.xlu2 %2479, %v2689_v2  }
  0x56   :  { %v2838_v12 = vperm.slane %v953_v7, 0  ;;  %v954_v7 = vperm.slane %v2835_v1, 4 }
  0x58   :  { %404 = vmatmul.f32.gmra.mxu0 %v2710_v14  ;;  %2486 = vset.pattern.permute.xlu0 %v2639_v52 }
  0x59   :  { %439 = vmatmul.f32.gmra.mxu1 %v2722_v22 }
  0x5a   :  { %477 = vmatmul.f32.gmra.mxu2 %v2724_v23 }
  0x5c   :  { %507 = vmatmul.f32.gmra.mxu3 %v2724_v23  ;;  %2483 = vset.pattern.permute.xlu1 %v2637_v50 }
  0x5d   :  { %1373 = vperm.xlu1 %2483, %v2691_v3   ;;  %2485 = vset.pattern.permute.xlu2 %v2637_v50 }
  0x5e   :  { %1369 = vperm.xlu2 %2485, %v2689_v2  }
  0x60   :  { %409 = vmatmul.f32.gmra.mxu0 %v2735_v30 }
  0x61   :  { %445 = vmatmul.f32.gmra.mxu1 %v2742_v32 }
  0x62   :  { %607 = vmatmul.f32.vlgmr.msrb.gmra.mxu2 %v2707_v13 }
  0x63   :  { %883 = vmatpush.msrb.mxu2 %v778_v47 }
  0x64   :  { %641 = vmatmul.f32.vlgmr.msrb.gmra.mxu3 %v2716_v18 }
  0x65   :  { %913 = vmatpush.msrb.mxu3 %v734_v45  ;;  %2484 = vset.pattern.permute.xlu1 %v2639_v52 }
  0x66   :  { %1592 = vperm.xlu1 %2484, %v2691_v3  }
  0x68   :  { %533 = vmatmul.f32.vlgmr.msrb.gmra.mxu0 %v2726_v27 }
  0x69   :  { %575 = vmatmul.f32.vlgmr.msrb.gmra.mxu1 %v2701_v9  ;;  %812 = vmatpush.msrb.mxu0 %v777_v46 }
  0x6a   :  { %845 = vmatpush.msrb.mxu1 %v734_v45  ;;  %612 = vmatmul.f32.gmra.mxu2 %v2710_v14 }
  0x6c   :  { %647 = vmatmul.f32.gmra.mxu3 %v2722_v22 }
  0x70   :  { %541 = vmatmul.f32.gmra.mxu0 %v2739_v31 }
  0x71   :  { %579 = vmatmul.f32.gmra.mxu1 %v2703_v10 }
  0x72   :  { %617 = vmatmul.f32.gmra.mxu2 %v2735_v30 }
  0x74   :  { %653 = vmatmul.f32.gmra.mxu3 %v2742_v32 }
  0x78   :  { %549 = vmatmul.f32.gmra.mxu0 %v2753_v35 }
  0x79   :  { %583 = vmatmul.f32.gmra.mxu1 %v2724_v23 }
  0x7a   :  { %741 = vmatmul.f32.vlgmr.msra.gmra.mxu2 %v2726_v27 }
  0x7c   :  { %783 = vmatmul.f32.vlgmr.msra.gmra.mxu3 %v2701_v9 }
  0x80   :  { %677 = vmatmul.f32.vlgmr.msra.gmra.mxu0 %v2701_v9 }
  0x81   :  { %707 = vmatmul.f32.vlgmr.msra.gmra.mxu1 %v2701_v9 }
  0x82   :  { %749 = vmatmul.f32.gmra.mxu2 %v2739_v31 }
  0x84   :  { %787 = vmatmul.f32.gmra.mxu3 %v2703_v10 }
  0x88   :  { %681 = vmatmul.f32.gmra.mxu0 %v2703_v10 }
  0x89   :  { %711 = vmatmul.f32.gmra.mxu1 %v2703_v10 }
  0x8a   :  { %757 = vmatmul.f32.gmra.mxu2 %v2753_v35  ;;  %v2865_v35 = vpop.permute.xlu1 %1045 }
  0x8c   :  { %791 = vmatmul.f32.gmra.mxu3 %v2724_v23 }
  0x90   :  { %685 = vmatmul.f32.gmra.mxu0 %v2724_v23 }
  0x91   :  { %715 = vmatmul.f32.gmra.mxu1 %v2724_v23 }
  0x92   :  { %885 = vmatmul.f32.vlgmr.msrb.gmra.mxu2 %v2701_v9  ;;  %v2881_v47 = vpop.permute.xlu1 %1102 }
  0x94   :  { %915 = vmatmul.f32.vlgmr.msrb.gmra.mxu3 %v2701_v9 }
  0x98   :  { %815 = vmatmul.f32.vlgmr.msrb.gmra.mxu0 %v2707_v13 }
  0x99   :  { %849 = vmatmul.f32.vlgmr.msrb.gmra.mxu1 %v2716_v18 }
  0x9a   :  { %889 = vmatmul.f32.gmra.mxu2 %v2703_v10 }
  0x9c   :  { %919 = vmatmul.f32.gmra.mxu3 %v2703_v10 }
  0x9d   :  { %v118_v54 = vpop.f32.mrf.mxu0  ;;  %v192_v58 = vpop.f32.mrf.mxu2 }
  0x9e   :  { %v160_v55 = vpop.f32.mrf.mxu1 }
  0x9f   :  { %v161_v59 = vadd.f32 %v160_v55, %v118_v54  ;;  %v226_v60 = vpop.f32.mrf.mxu3 }
  0xa0   :  { %820 = vmatmul.f32.gmra.mxu0 %v2710_v14 }
  0xa1   :  { %855 = vmatmul.f32.gmra.mxu1 %v2722_v22  ;;  %v193_v63 = vadd.f32 %v192_v58, %v161_v59 }
  0xa2   :  { %893 = vmatmul.f32.gmra.mxu2 %v2724_v23 }
  0xa3   :  { %v227_v3 = vadd.f32 %v226_v60, %v193_v63  ;;  %v2898_v63 = vpop.permute.xlu0 %1041 }
  0xa4   :  { %923 = vmatmul.f32.gmra.mxu3 %v2724_v23  ;;  %v2852_v23 = vpop.permute.xlu2 %1049 }
  0xa5   :  { %v126_v56 = vpop.f32.mrf.mxu0  ;;  %v197_v0 = vpop.f32.mrf.mxu2 }
  0xa6   :  { %v164_v57 = vpop.f32.mrf.mxu1 }
  0xa7   :  { %v232_v8 = vpop.f32.mrf.mxu3  ;;  %v165_v9 = vadd.f32 %v164_v57, %v126_v56  ;;  %v2890_v57 = vpop.permute.xlu1 %1183 }
  0xa8   :  { %825 = vmatmul.f32.gmra.mxu0 %v2735_v30 }
  0xa9   :  { %861 = vmatmul.f32.gmra.mxu1 %v2742_v32  ;;  %v198_v13 = vadd.f32 %v197_v0, %v165_v9 }
  0xab   :  { %v233_v19 = vadd.f32 %v232_v8, %v198_v13 }
  0xac   :  { %v2859_v31 = vpop.permute.xlu2 %1106 }
  0xad   :  { %v134_v61 = vpop.f32.mrf.mxu0  ;;  %v202_v16 = vpop.f32.mrf.mxu2 }
  0xae   :  { %v168_v62 = vpop.f32.mrf.mxu1 }
  0xaf   :  { %v238_v21 = vpop.f32.mrf.mxu3  ;;  %v169_v29 = vadd.f32 %v168_v62, %v134_v61  ;;  %v2905_v8 = vpop.permute.xlu1 %1276 }
  0xb1   :  { %v203_v32 = vadd.f32 %v202_v16, %v169_v29 }
  0xb3   :  { %v239_v37 = vadd.f32 %v238_v21, %v203_v32 }
  0xb4   :  { %v2876_v43 = vpop.permute.xlu2 %1175 }
  0xb5   :  { %v262_v4 = vpop.f32.mrf.mxu0  ;;  %v326_v26 = vpop.f32.mrf.mxu2 }
  0xb6   :  { %v292_v5 = vpop.f32.mrf.mxu1  ;;  %v263_v6 = vadd.f32 %v262_v4, %v227_v3 }
  0xb7   :  { %v368_v28 = vpop.f32.mrf.mxu3  ;;  %v2924_v21 = vpop.permute.xlu1 %1296 }
  0xb8   :  { %v293_v10 = vadd.f32 %v292_v5, %v263_v6  ;;  %v369_v44 = vadd.f32 %v368_v28, %v326_v26  ;;  %4160 = vst [vmem:[#allocation21_spill] sm:$0xff] %v2924_v21 }
  0xba   :  { %v927_v11 = vmax.f32 %v293_v10, 0.0 }
  0xbc   :  { %v2840_v14 = vmin.f32 %v927_v11, 6.0  ;;  %v2888_v55 = vpop.permute.xlu2 %1280 }
  0xbd   :  { %v266_v18 = vpop.f32.mrf.mxu0  ;;  %v334_v34 = vpop.f32.mrf.mxu2 }
  0xbe   :  { %4154 = vst [vmem:[#allocation15_spill] sm:$0xff] %v2840_v14  ;;  %1477 = vrot.lane.b32.xlu0 %v2840_v14, %s2641_s2  ;;  %1064 = vrot.lane.b32.xlu1 %v2840_v14, %s2642_s3  ;;  %v965_v17 = vmul.f32 %v2838_v12, %v2840_v14  ;;  %v267_v22 = vadd.f32 %v266_v18, %v233_v19  ;;  %v296_v24 = vpop.f32.mrf.mxu1  ;;  %v978_v18 = vperm.slane %v2835_v1, 5  ;;  %v2920_v19 = vpop.permute.xlu0 %1110 }
  0xbf   :  { %v989_v25 = vmul.f32 %v2850_v20, %v2840_v14  ;;  %v372_v38 = vpop.f32.mrf.mxu3  ;;  %v2938_v32 = vpop.permute.xlu1 %1304 }
  0xc0   :  { %1234 = vrot.lane.b32.xlu2 %v965_v17, %s2643_s9  ;;  %v297_v27 = vadd.f32 %v296_v24, %v267_v22  ;;  %v373_v61 = vadd.f32 %v372_v38, %v334_v34  ;;  %v2927_v24 = vperm.slane %v978_v18, 1  ;;  %4162 = vst [vmem:[#allocation23_spill] sm:$0xff] %v2938_v32 }
  0xc2   :  { %v931_v30 = vmax.f32 %v297_v27, 0.0 }
  0xc4   :  { %v2861_v33 = vmin.f32 %v931_v30, 6.0  ;;  %v2900_v0 = vpop.permute.xlu2 %1300 }
  0xc5   :  { %v270_v36 = vpop.f32.mrf.mxu0  ;;  %v2879_v46 = vpop.f32.mrf.mxu2  ;;  %4157 = vst [vmem:[#allocation18_spill] sm:$0xff] %v2900_v0 }
  0xc6   :  { %1137 = vrot.lane.b32.xlu1 %v989_v25, %s2644_s10  ;;  %1001 = vrot.lane.b32.xlu0 %v965_v17, %s2645_s11  ;;  %4155 = vst [vmem:[#allocation16_spill] sm:$0xff] %v2861_v33  ;;  %v271_v39 = vadd.f32 %v270_v36, %v239_v37  ;;  %v969_v40 = vmul.f32 %v2838_v12, %v2861_v33  ;;  %v300_v41 = vpop.f32.mrf.mxu1  ;;  %v2936_v29 = vpop.permute.xlu0 %1179 }
  0xc7   :  { %v993_v42 = vmul.f32 %v2850_v20, %v2861_v33  ;;  %v376_v51 = vpop.f32.mrf.mxu3 }
  0xc8   :  { %1331 = vrot.lane.b32.xlu2 %v989_v25, %s2646_s12  ;;  %v301_v45 = vadd.f32 %v300_v41, %v271_v39  ;;  %v377_v37 = vadd.f32 %v376_v51, %v2879_v46 }
  0xca   :  { %v935_v49 = vmax.f32 %v301_v45, 0.0 }
  0xcc   :  { %v2885_v53 = vmin.f32 %v935_v49, 6.0  ;;  %v2915_v15 = vpop.permute.xlu2 %1462 }
  0xcd   :  { %v400_v48 = vpop.f32.mrf.mxu0  ;;  %v470_v56 = vpop.f32.mrf.mxu2  ;;  %4159 = vst [vmem:[#allocation20_spill] sm:$0xff] %v2915_v15 }
  0xce   :  { %1416 = vrot.lane.b32.xlu1 %v965_v17, %s2647_s13  ;;  %1550 = vrot.lane.b32.xlu0 %v989_v25, %s2648_s14  ;;  %v401_v50 = vadd.f32 %v400_v48, %v369_v44  ;;  %v434_v52 = vpop.f32.mrf.mxu1  ;;  %4156 = vst [vmem:[#allocation17_spill] sm:$0xff] %v2885_v53  ;;  %v973_v59 = vmul.f32 %v2838_v12, %v2885_v53  ;;  %v2913_v12 = vperm.slane %v954_v7, 0  ;;  %v2952_v44 = vpop.permute.xlu1 %1377 }
  0xcf   :  { %v500_v60 = vpop.f32.mrf.mxu3  ;;  %v997_v6 = vmul.f32 %v2850_v20, %v2885_v53  ;;  %v2954_v45 = vpop.permute.xlu0 %1272 }
  0xd0   :  { %1066 = vrot.lane.b32.xlu2 %v2861_v33, %s2642_s3  ;;  %v435_v54 = vadd.f32 %v434_v52, %v401_v50  ;;  %4164 = vst [vmem:[#allocation25_spill] sm:$0xff] %v2954_v45 }
  0xd2   :  { %v471_v58 = vadd.f32 %v470_v56, %v435_v54 }
  0xd4   :  { %v501_v62 = vadd.f32 %v500_v60, %v471_v58  ;;  %v2931_v28 = vpop.permute.xlu2 %1458 }
  0xd5   :  { %v405_v3 = vpop.f32.mrf.mxu0  ;;  %v474_v13 = vpop.f32.mrf.mxu2  ;;  %4161 = vst [vmem:[#allocation22_spill] sm:$0xff] %v2931_v28 }
  0xd6   :  { %1236 = vrot.lane.b32.xlu1 %v969_v40, %s2643_s9  ;;  %1479 = vrot.lane.b32.xlu0 %v2861_v33, %s2641_s2  ;;  %v928_v4 = vmax.f32 %v501_v62, 0.0  ;;  %v406_v5 = vadd.f32 %v405_v3, %v373_v61  ;;  %v440_v9 = vpop.f32.mrf.mxu1  ;;  %v2961_v56 = vpop.permute.xlu1 %1596 }
  0xd7   :  { %v504_v20 = vpop.f32.mrf.mxu3  ;;  %4166 = vst [vmem:[#allocation27_spill] sm:$0xff] %v2961_v56  ;;  %v2963_v58 = vpop.permute.xlu0 %1523 }
  0xd8   :  { %1139 = vrot.lane.b32.xlu2 %v993_v42, %s2644_s10  ;;  %v2909_v10 = vmin.f32 %v928_v4, 6.0  ;;  %v441_v11 = vadd.f32 %v440_v9, %v406_v5  ;;  %4167 = vst [vmem:[#allocation28_spill] sm:$0xff] %v2963_v58 }
  0xda   :  { %4158 = vst [vmem:[#allocation19_spill] sm:$0xff] %v2909_v10  ;;  %v475_v16 = vadd.f32 %v474_v13, %v441_v11  ;;  %v966_v17 = vmul.f32 %v2913_v12, %v2909_v10  ;;  %v990_v27 = vmul.f32 %v2927_v24, %v2909_v10 }
  0xdc   :  { %v505_v22 = vadd.f32 %v504_v20, %v475_v16  ;;  %v2949_v41 = vpop.permute.xlu2 %1454 }
  0xdd   :  { %v410_v25 = vpop.f32.mrf.mxu0  ;;  %v478_v36 = vpop.f32.mrf.mxu2  ;;  %4163 = vst [vmem:[#allocation24_spill] sm:$0xff] %v2949_v41 }
  0xde   :  { %1418 = vrot.lane.b32.xlu1 %v969_v40, %s2647_s13  ;;  %1003 = vrot.lane.b32.xlu0 %v969_v40, %s2645_s11  ;;  %v932_v26 = vmax.f32 %v505_v22, 0.0  ;;  %v446_v30 = vpop.f32.mrf.mxu1  ;;  %v2973_v7 = vpop.permute.xlu1 %1373 }
  0xdf   :  { %v508_v40 = vpop.f32.mrf.mxu3  ;;  %4169 = vst [vmem:[#allocation30_spill] sm:$0xff] %v2973_v7  ;;  %v2975_v9 = vpop.permute.xlu0 %1519 }
  0xe0   :  { %1333 = vrot.lane.b32.xlu2 %v993_v42, %s2646_s12  ;;  %v2940_v34 = vmin.f32 %v932_v26, 6.0  ;;  %4170 = vst [vmem:[#allocation31_spill] sm:$0xff] %v2975_v9 }
  0xe2   :  { %v994_v38 = vmul.f32 %v2927_v24, %v2940_v34  ;;  %v970_v13 = vmul.f32 %v2913_v12, %v2940_v34 }
  0xe4   :  { %v2959_v52 = vpop.permute.xlu2 %1369 }
  0xe5   :  { %v534_v39 = vpop.f32.mrf.mxu0  ;;  %v608_v49 = vpop.f32.mrf.mxu2  ;;  %4165 = vst [vmem:[#allocation26_spill] sm:$0xff] %v2959_v52 }
  0xe6   :  { %1068 = vrot.lane.b32.xlu0 %v2885_v53, %s2642_s3  ;;  %1005 = vrot.lane.b32.xlu1 %v973_v59, %s2645_s11  ;;  %v576_v46 = vpop.f32.mrf.mxu1  ;;  %v2989_v26 = vpop.permute.xlu1 %1592 }
  0xe7   :  { %v642_v54 = vpop.f32.mrf.mxu3  ;;  %4172 = vst [vmem:[#allocation33_spill] sm:$0xff] %v2989_v26 }
  0xe8   :  { %1552 = vrot.lane.b32.xlu2 %v993_v42, %s2648_s14  ;;  %v411_v42 = vadd.f32 %v410_v25, %v377_v37 }
  0xea   :  { %v447_v48 = vadd.f32 %v446_v30, %v411_v42 }
  0xec   :  { %v479_v51 = vadd.f32 %v478_v36, %v447_v48 }
  0xed   :  { %v542_v50 = vpop.f32.mrf.mxu0  ;;  %v613_v61 = vpop.f32.mrf.mxu2 }
  0xee   :  { %1420 = vrot.lane.b32.xlu0 %v973_v59, %s2647_s13  ;;  %1141 = vrot.lane.b32.xlu1 %v997_v6, %s2644_s10  ;;  %v509_v60 = vadd.f32 %v508_v40, %v479_v51 }
  0xef   :  { %v648_v5 = vpop.f32.mrf.mxu3 }
  0xf0   :  { %1481 = vrot.lane.b32.xlu2 %v2885_v53, %s2641_s2  ;;  %v936_v62 = vmax.f32 %v509_v60, 0.0 }
  0xf5   :  { %v550_v3 = vpop.f32.mrf.mxu0  ;;  %v618_v16 = vpop.f32.mrf.mxu2 }
  0xf6   :  { %1240 = vrot.lane.b32.xlu0 %v966_v17, %s2643_s9  ;;  %1335 = vrot.lane.b32.xlu1 %v997_v6, %s2646_s12 }
  0xf7   :  { %v654_v22 = vpop.f32.mrf.mxu3 }
  0xf8   :  { %1238 = vrot.lane.b32.xlu2 %v973_v59, %s2643_s9  ;;  %v580_v59 = vpop.f32.mrf.mxu1 }
  0xfd   :  { %v678_v20 = vpop.f32.mrf.mxu0 }
  0xfe   :  { %1337 = vrot.lane.b32.xlu0 %v990_v27, %s2646_s12  ;;  %1070 = vrot.lane.b32.xlu1 %v2909_v10, %s2642_s3 }
 0x100   :  { %1554 = vrot.lane.b32.xlu2 %v997_v6, %s2648_s14  ;;  %v2971_v6 = vmin.f32 %v936_v62, 6.0  ;;  %v584_v11 = vpop.f32.mrf.mxu1 }
 0x101   :  { %v585_v52 = vadd.f32 %v584_v11, %v550_v3 }
 0x102   :  { %v998_v40 = vmul.f32 %v2927_v24, %v2971_v6  ;;  %v974_v48 = vmul.f32 %v2913_v12, %v2971_v6 }
 0x105   :  { %v682_v42 = vpop.f32.mrf.mxu0 }
 0x106   :  { %1145 = vrot.lane.b32.xlu0 %v994_v38, %s2644_s10  ;;  %1483 = vrot.lane.b32.xlu1 %v2909_v10, %s2641_s2 }
 0x108   :  { %1143 = vrot.lane.b32.xlu2 %v990_v27, %s2644_s10  ;;  %v708_v30 = vpop.f32.mrf.mxu1 }
 0x10d   :  { %v686_v12 = vpop.f32.mrf.mxu0 }
 0x10e   :  { %1339 = vrot.lane.b32.xlu0 %v994_v38, %s2646_s12  ;;  %1007 = vrot.lane.b32.xlu1 %v966_v17, %s2645_s11 }
 0x110   :  { %1422 = vrot.lane.b32.xlu2 %v966_v17, %s2647_s13  ;;  %v577_v17 = vadd.f32 %v576_v46, %v534_v39  ;;  %v581_v39 = vadd.f32 %v580_v59, %v542_v50  ;;  %v712_v50 = vpop.f32.mrf.mxu1  ;;  %v3007_v59 = vld [vmem:[#allocation8 + $0x8] sm:$0xff] }
 0x111   :  { %4177 = vst [vmem:[#allocation38_spill] sm:$0xff] %v3007_v59 }
 0x112   :  { %v609_v25 = vadd.f32 %v608_v49, %v577_v17  ;;  %v784_v49 = vpop.f32.mrf.mxu3  ;;  %v614_v51 = vadd.f32 %v613_v61, %v581_v39  ;;  %v955_v17 = vperm.slane %v3007_v59, 0 }
 0x114   :  { %v643_v36 = vadd.f32 %v642_v54, %v609_v25 }
 0x115   :  { %v816_v11 = vpop.f32.mrf.mxu0 }
 0x116   :  { %1558 = vrot.lane.b32.xlu0 %v994_v38, %s2648_s14  ;;  %1556 = vrot.lane.b32.xlu1 %v990_v27, %s2648_s14  ;;  %v2991_v27 = vpop.permute.xlu0 %1515  ;;  %v742_v38 = vpop.f32.mrf.mxu2  ;;  %v679_v46 = vadd.f32 %v678_v20, %v643_v36 }
 0x117   :  { %4173 = vst [vmem:[#allocation34_spill] sm:$0xff] %v2991_v27 }
 0x118   :  { %1072 = vrot.lane.b32.xlu2 %v2940_v34, %s2642_s3  ;;  %v709_v24 = vadd.f32 %v708_v30, %v679_v46  ;;  %v3019_v30 = vperm.slane %v955_v17, 0  ;;  %v785_v17 = vadd.f32 %v784_v49, %v742_v38 }
 0x11a   :  { %v2969_v4 = vpop.permute.xlu2 %1234  ;;  %v929_v25 = vmax.f32 %v709_v24, 0.0  ;;  %v788_v46 = vpop.f32.mrf.mxu3  ;;  %v817_v7 = vadd.f32 %v816_v11, %v785_v17 }
 0x11b   :  { %4168 = vst [vmem:[#allocation29_spill] sm:$0xff] %v2969_v4  ;;  %v716_v24 = vpop.f32.mrf.mxu1 }
 0x11e   :  { %1074 = vrot.lane.b32.xlu0 %v2971_v6, %s2642_s3  ;;  %1485 = vrot.lane.b32.xlu1 %v2940_v34, %s2641_s2  ;;  %v750_v20 = vpop.f32.mrf.mxu2 }
 0x120   :  { %1009 = vrot.lane.b32.xlu2 %v970_v13, %s2645_s11 }
 0x122   :  { %v2984_v18 = vpop.permute.xlu2 %1331 }
 0x123   :  { %4171 = vst [vmem:[#allocation32_spill] sm:$0xff] %v2984_v18  ;;  %v792_v18 = vpop.f32.mrf.mxu3  ;;  %v850_v41 = vpop.f32.mrf.mxu1 }
 0x124   :  { %v851_v38 = vadd.f32 %v850_v41, %v817_v7 }
 0x126   :  { %1487 = vrot.lane.b32.xlu0 %v2971_v6, %s2641_s2  ;;  %1242 = vrot.lane.b32.xlu1 %v970_v13, %s2643_s9 }
 0x128   :  { %1424 = vrot.lane.b32.xlu2 %v970_v13, %s2647_s13  ;;  %v649_v13 = vadd.f32 %v648_v5, %v614_v51  ;;  %v3021_v5 = vmin.f32 %v929_v25, 6.0 }
 0x12a   :  { %v2994_v37 = vpop.permute.xlu2 %1066  ;;  %v683_v61 = vadd.f32 %v682_v42, %v649_v13  ;;  %4181 = vst [vmem:[#allocation42_spill] sm:$0xff] %v3021_v5  ;;  %v3027_v26 = vmul.f32 %v3019_v30, %v3021_v5  ;;  %v979_v42 = vperm.slane %v3007_v59, 1  ;;  %v619_v13 = vadd.f32 %v618_v16, %v585_v52 }
 0x12b   :  { %4174 = vst [vmem:[#allocation35_spill] sm:$0xff] %v2994_v37 }
 0x12e   :  { %1560 = vrot.lane.b32.xlu0 %v998_v40, %s2648_s14  ;;  %1147 = vrot.lane.b32.xlu1 %v998_v40, %s2644_s10 }
 0x130   :  { %v3002_v60 = vpop.permute.xlu0 %1477  ;;  %v3004_v54 = vpop.permute.xlu1 %1064  ;;  %1011 = vrot.lane.b32.xlu2 %v974_v48, %s2645_s11 }
 0x131   :  { %4175 = vst [vmem:[#allocation36_spill] sm:$0xff] %v3002_v60 }
 0x132   :  { %4176 = vst [vmem:[#allocation37_spill] sm:$0xff] %v3004_v54  ;;  %v3009_v62 = vpop.permute.xlu2 %1139 }
 0x133   :  { %4178 = vst [vmem:[#allocation39_spill] sm:$0xff] %v3009_v62 }
 0x136   :  { %1588 = vperm.xlu0 %2486, %v2689_v2   ;;  %1426 = vrot.lane.b32.xlu1 %v974_v48, %s2647_s13  ;;  %v713_v2 = vadd.f32 %v712_v50, %v683_v61  ;;  %v987_v61 = vperm.slane %v979_v42, 1 }
 0x138   :  { %v3014_v36 = vpop.permute.xlu1 %1137  ;;  %v3016_v39 = vpop.permute.xlu0 %1001  ;;  %1244 = vrot.lane.b32.xlu2 %v974_v48, %s2643_s9  ;;  %v933_v25 = vmax.f32 %v713_v2, 0.0  ;;  %v3048_v52 = vmul.f32 %v987_v61, %v3021_v5 }
 0x139   :  { %4179 = vst [vmem:[#allocation40_spill] sm:$0xff] %v3014_v36  ;;  %v758_v48 = vpop.f32.mrf.mxu2 }
 0x13a   :  { %4180 = vst [vmem:[#allocation41_spill] sm:$0xff] %v3016_v39  ;;  %v3023_v51 = vpop.permute.xlu2 %1333  ;;  %v3041_v60 = vmin.f32 %v933_v25, 6.0 }
 0x13b   :  { %4182 = vst [vmem:[#allocation43_spill] sm:$0xff] %v3023_v51  ;;  %v655_v51 = vadd.f32 %v654_v22, %v619_v13 }
 0x13c   :  { %4186 = vst [vmem:[#allocation47_spill] sm:$0xff] %v3041_v60  ;;  %v3059_v17 = vmul.f32 %v987_v61, %v3041_v60  ;;  %v971_v25 = vmul.f32 %v3019_v30, %v3041_v60 }
 0x13d   :  { %v687_v16 = vadd.f32 %v686_v12, %v655_v51  ;;  %v916_v12 = vpop.f32.mrf.mxu3 }
 0x13e   :  { %1013 = vrot.lane.b32.xlu0 %v3027_v26, %s2645_s11  ;;  %1076 = vrot.lane.b32.xlu1 %v3021_v5, %s2642_s3 }
 0x13f   :  { %v717_v42 = vadd.f32 %v716_v24, %v687_v16  ;;  %v789_v24 = vadd.f32 %v788_v46, %v750_v20 }
 0x140   :  { %v3034_v27 = vpop.permute.xlu1 %1416  ;;  %v3036_v3 = vpop.permute.xlu0 %1550  ;;  %1341 = vrot.lane.b32.xlu2 %v998_v40, %s2646_s12 }
 0x141   :  { %4183 = vst [vmem:[#allocation44_spill] sm:$0xff] %v3034_v27  ;;  %v886_v22 = vpop.f32.mrf.mxu2  ;;  %v937_v41 = vmax.f32 %v717_v42, 0.0 }
 0x142   :  { %4184 = vst [vmem:[#allocation45_spill] sm:$0xff] %v3036_v3  ;;  %v3039_v50 = vpop.permute.xlu2 %1552  ;;  %v887_v13 = vadd.f32 %v886_v22, %v851_v38  ;;  %v956_v38 = vperm.slane %v3007_v59, 4  ;;  %v821_v22 = vpop.f32.mrf.mxu0 }
 0x143   :  { %4185 = vst [vmem:[#allocation46_spill] sm:$0xff] %v3039_v50  ;;  %v3075_v3 = vmin.f32 %v937_v41, 6.0  ;;  %v822_v45 = vadd.f32 %v821_v22, %v789_v24  ;;  %v793_v22 = vadd.f32 %v792_v18, %v758_v48 }
 0x144   :  { %v917_v7 = vadd.f32 %v916_v12, %v887_v13  ;;  %v3080_v42 = vperm.slane %v956_v38, 0  ;;  %v856_v13 = vpop.f32.mrf.mxu1 }
 0x145   :  { %4191 = vst [vmem:[#allocation52_spill] sm:$0xff] %v3075_v3  ;;  %v857_v41 = vadd.f32 %v856_v13, %v822_v45  ;;  %v999_v38 = vmul.f32 %v987_v61, %v3075_v3 }
 0x146   :  { %1246 = vrot.lane.b32.xlu0 %v3027_v26, %s2643_s9  ;;  %1491 = vrot.lane.b32.xlu1 %v3041_v60, %s2641_s2  ;;  %v930_v50 = vmax.f32 %v917_v7, 0.0 }
 0x148   :  { %v3050_v40 = vpop.permute.xlu1 %1236  ;;  %v3052_v49 = vpop.permute.xlu0 %1479  ;;  %1149 = vrot.lane.b32.xlu2 %v3048_v52, %s2644_s10  ;;  %v3082_v12 = vmin.f32 %v930_v50, 6.0 }
 0x149   :  { %4187 = vst [vmem:[#allocation48_spill] sm:$0xff] %v3052_v49  ;;  %v890_v24 = vpop.f32.mrf.mxu2 }
 0x14a   :  { %v3056_v2 = vpop.permute.xlu2 %1481  ;;  %4192 = vst [vmem:[#allocation53_spill] sm:$0xff] %v3082_v12  ;;  %v3093_v7 = vmul.f32 %v3080_v42, %v3082_v12  ;;  %v826_v10 = vpop.f32.mrf.mxu0  ;;  %v891_v50 = vadd.f32 %v890_v24, %v857_v41  ;;  %v975_v41 = vmul.f32 %v3019_v30, %v3075_v3 }
 0x14b   :  { %4188 = vst [vmem:[#allocation49_spill] sm:$0xff] %v3056_v2  ;;  %v827_v53 = vadd.f32 %v826_v10, %v793_v22  ;;  %v980_v10 = vperm.slane %v3007_v59, 5 }
 0x14c   :  { %v862_v33 = vpop.f32.mrf.mxu1 }
 0x14d   :  { %v863_v61 = vadd.f32 %v862_v33, %v827_v53 }
 0x14e   :  { %1151 = vrot.lane.b32.xlu0 %v3059_v17, %s2644_s10  ;;  %1015 = vrot.lane.b32.xlu1 %v971_v25, %s2645_s11 }
 0x150   :  { %v3066_v51 = vpop.permute.xlu1 %1418  ;;  %v3068_v11 = vpop.permute.xlu0 %1003  ;;  %1078 = vrot.lane.b32.xlu2 %v3041_v60, %s2642_s3 }
 0x151   :  { %4189 = vst [vmem:[#allocation50_spill] sm:$0xff] %v3066_v51  ;;  %v894_v24 = vpop.f32.mrf.mxu2 }
 0x152   :  { %4190 = vst [vmem:[#allocation51_spill] sm:$0xff] %v3068_v11  ;;  %v3072_v16 = vpop.permute.xlu2 %1238  ;;  %v895_v22 = vadd.f32 %v894_v24, %v863_v61 }
 0x156   :  { %1080 = vrot.lane.b32.xlu0 %v3075_v3, %s2642_s3  ;;  %1248 = vrot.lane.b32.xlu1 %v971_v25, %s2643_s9 }
 0x158   :  { %v3084_v20 = vpop.permute.xlu0 %1068  ;;  %1430 = vrot.lane.b32.xlu2 %v971_v25, %s2647_s13  ;;  %v3087_v46 = vpop.permute.xlu1 %1005 }
 0x159   :  { %4193 = vst [vmem:[#allocation54_spill] sm:$0xff] %v3084_v20  ;;  %v920_v25 = vpop.f32.mrf.mxu3 }
 0x15a   :  { %4194 = vst [vmem:[#allocation55_spill] sm:$0xff] %v3087_v46  ;;  %v3089_v60 = vpop.permute.xlu2 %1554  ;;  %v921_v18 = vadd.f32 %v920_v25, %v891_v50  ;;  %v988_v25 = vperm.slane %v980_v10, 1  ;;  %v1025_v10 = vlaneseq }
 0x15b   :  { %4195 = vst [vmem:[#allocation56_spill] sm:$0xff] %v3089_v60 }
 0x15c   :  { %v934_v21 = vmax.f32 %v921_v18, 0.0 }
 0x15e   :  { %1019 = vrot.lane.b32.xlu0 %v3093_v7, %s2645_s11  ;;  %1153 = vrot.lane.b32.xlu1 %v999_v38, %s2644_s10  ;;  %v3118_v53 = vmin.f32 %v934_v21, 6.0 }
 0x160   :  { %v3099_v45 = vpop.permute.xlu0 %1420  ;;  %1493 = vrot.lane.b32.xlu2 %v3075_v3, %s2641_s2  ;;  %v3103_v13 = vpop.permute.xlu1 %1141  ;;  %4200 = vst [vmem:[#allocation61_spill] sm:$0xff] %v3118_v53  ;;  %v3123_v3 = vmul.f32 %v988_v25, %v3118_v53 }
 0x161   :  { %4196 = vst [vmem:[#allocation57_spill] sm:$0xff] %v3099_v45  ;;  %v924_v33 = vpop.f32.mrf.mxu3 }
 0x162   :  { %4197 = vst [vmem:[#allocation58_spill] sm:$0xff] %v3103_v13  ;;  %v3105_v48 = vpop.permute.xlu2 %1143  ;;  %v925_v18 = vadd.f32 %v924_v33, %v895_v22 }
 0x164   :  { %v938_v61 = vmax.f32 %v925_v18, 0.0 }
 0x166   :  { %1252 = vrot.lane.b32.xlu0 %v3093_v7, %s2643_s9  ;;  %1432 = vrot.lane.b32.xlu1 %v975_v41, %s2647_s13 }
 0x168   :  { %v3113_v14 = vpop.permute.xlu0 %1240  ;;  %1017 = vrot.lane.b32.xlu2 %v975_v41, %s2645_s11  ;;  %v3116_v50 = vpop.permute.xlu1 %1335 }
 0x169   :  { %4198 = vst [vmem:[#allocation59_spill] sm:$0xff] %v3113_v14 }
 0x16a   :  { %4199 = vst [vmem:[#allocation60_spill] sm:$0xff] %v3116_v50  ;;  %v3120_v30 = vpop.permute.xlu2 %1422  ;;  %v3135_v50 = vmin.f32 %v938_v61, 6.0  ;;  %v972_v61 = vmul.f32 %v3080_v42, %v3118_v53 }
 0x16b   :  { %4201 = vst [vmem:[#allocation62_spill] sm:$0xff] %v3120_v30 }
 0x16c   :  { %4203 = vst [vmem:[#allocation64_spill] sm:$0xff] %v3135_v50 }
 0x16e   :  { %1157 = vrot.lane.b32.xlu0 %v3123_v3, %s2644_s10  ;;  %1347 = vrot.lane.b32.xlu1 %v999_v38, %s2646_s12 }
 0x170   :  { %v3128_v24 = vpop.permute.xlu0 %1337  ;;  %1250 = vrot.lane.b32.xlu2 %v975_v41, %s2643_s9  ;;  %v3131_v59 = vpop.permute.xlu1 %1070  ;;  %v3146_v41 = vand.u32 127, %v1025_v10 }
 0x171   :  { %4202 = vst [vmem:[#allocation63_spill] sm:$0xff] %v3128_v24  ;;  %v2649_v24 = vmov 17  }
 0x172   :  { %v3133_v21 = vpop.permute.xlu2 %1072  ;;  %vm1088_vm1 = vcmp.lt.s32.totalorder %v3146_v41, 16  ;;  %2487 = vset.pattern.permute.xlu1 %v2649_v24  ;;  %2488 = vset.pattern.permute.xlu2 %v2649_v24  ;;  %vm1161_vm2 = vcmp.lt.s32.totalorder %v3146_v41, 15  ;;  %vm1027_vm3 = vcmp.lt.s32.totalorder %v3146_v41, 17  ;;  %vm1440_vm4 = vcmp.lt.s32.totalorder %v3146_v41, 113 }
 0x173   :  { %v1095_v10 = vsel %vm1088_vm1, %v3004_v54, %v3131_v59  ;;  %v1168_v27 = vsel %vm1161_vm2, %v3014_v36, %v3105_v48  ;;  %vm1501_vm5 = vcmp.lt.s32.totalorder %v3146_v41, 112  ;;  %vm1258_vm6 = vcmp.lt.s32.totalorder %v3146_v41, 1 }
 0x174   :  { %v1114_v54 = vmul.f32 %v2881_v47, %v1095_v10  ;;  %v1187_v14 = vmul.f32 %v2876_v43, %v1168_v27  ;;  %vm1574_vm7 = vcmp.lt.s32.totalorder %v3146_v41, 111  ;;  %vm1355_vm8 = vcmp.lt.s32.totalorder %v3146_v41, 127 }
 0x176   :  { %1086 = vrot.lane.b32.xlu0 %v3135_v50, %s2642_s3  ;;  %1082 = vrot.lane.b32.xlu1 %v3082_v12, %s2642_s3 }
 0x178   :  { %v3141_v22 = vpop.permute.xlu0 %1145  ;;  %1566 = vrot.lane.b32.xlu2 %v999_v38, %s2648_s14  ;;  %v3144_v33 = vpop.permute.xlu1 %1483  ;;  %v3158_v38 = vmul.f32 %v988_v25, %v3082_v12 }
 0x179   :  { %4204 = vst [vmem:[#allocation65_spill] sm:$0xff] %v3144_v33 }
 0x17a   :  { %v3148_v18 = vpop.permute.xlu2 %1009 }
 0x17e   :  { %1345 = vrot.lane.b32.xlu0 %v3059_v17, %s2646_s12  ;;  %1021 = vrot.lane.b32.xlu1 %v972_v61, %s2645_s11 }
 0x180   :  { %v3165_v33 = vpop.permute.xlu0 %1339  ;;  %1155 = vrot.lane.b32.xlu2 %v3158_v38, %s2644_s10  ;;  %v3169_v24 = vpop.permute.xlu1 %1007 }
 0x181   :  { %4205 = vst [vmem:[#allocation66_spill] sm:$0xff] %v3165_v33  ;;  %v1034_v30 = vsel %vm1027_vm3, %v3016_v39, %v3169_v24  ;;  %v3198_v39 = vmul.f32 %v988_v25, %v3135_v50 }
 0x182   :  { %v1053_v4 = vmul.f32 %v2898_v63, %v1034_v30  ;;  %v3181_v33 = vpop.permute.xlu2 %1424 }
 0x184   :  { %v1126_v62 = vadd.f32 %v1114_v54, %v1053_v4  ;;  %v1448_v4 = vsel %vm1440_vm4, %v3066_v51, %v3181_v33 }
 0x185   :  { %v1469_v25 = vmul.f32 %v2931_v28, %v1448_v4 }
 0x186   :  { %v3184_v37 = vadd.f32 %v1187_v14, %v1126_v62  ;;  %1564 = vrot.lane.b32.xlu0 %v3059_v17, %s2648_s14  ;;  %1254 = vrot.lane.b32.xlu1 %v972_v61, %s2643_s9  ;;  %v976_v14 = vmul.f32 %v3080_v42, %v3135_v50 }
 0x188   :  { %4206 = vst [vmem:[#allocation67_spill] sm:$0xff] %v3184_v37  ;;  %v3189_v36 = vpop.permute.xlu0 %1558  ;;  %1084 = vrot.lane.b32.xlu2 %v3118_v53, %s2642_s3  ;;  %v3193_v10 = vpop.permute.xlu1 %1556 }
 0x189   :  { %4207 = vst [vmem:[#allocation68_spill] sm:$0xff] %v3189_v36 }
 0x18a   :  { %4208 = vst [vmem:[#allocation69_spill] sm:$0xff] %v3193_v10  ;;  %v3195_v30 = vpop.permute.xlu2 %1011 }
 0x18b   :  { %v1036_v27 = vsel %vm1027_vm3, %v3087_v46, %v3195_v30 }
 0x18c   :  { %v1061_v51 = vmul.f32 %v2852_v23, %v1036_v27 }
 0x18e   :  { %1562 = vrot.lane.b32.xlu0 %v3048_v52, %s2648_s14  ;;  %1159 = vrot.lane.b32.xlu1 %v3198_v39, %s2644_s10 }
 0x190   :  { %v3216_v54 = vpop.permute.xlu0 %1074  ;;  %1023 = vrot.lane.b32.xlu2 %v976_v14, %s2645_s11  ;;  %v3219_v62 = vpop.permute.xlu1 %1485 }
 0x191   :  { %v1097_v17 = vsel %vm1088_vm1, %v3084_v20, %v3216_v54  ;;  %v1509_v42 = vsel %vm1501_vm5, %v3052_v49, %v3219_v62  ;;  %v1316_v49 = vmul.f32 %v2938_v32, %v2971_v6 }
 0x192   :  { %v1122_v37 = vmul.f32 %v2920_v19, %v1097_v17  ;;  %v1530_v10 = vmul.f32 %v2975_v9, %v1509_v42  ;;  %v3234_v46 = vpop.permute.xlu2 %1244 }
 0x193   :  { %v1267_v20 = vsel %vm1258_vm6, %v3072_v16, %v3234_v46 }
 0x194   :  { %v1134_v36 = vadd.f32 %v1122_v37, %v1061_v51  ;;  %v3240_v11 = vadd.f32 %v1530_v10, %v1469_v25  ;;  %v1292_v4 = vmul.f32 %v2888_v55, %v1267_v20  ;;  %v1312_v37 = vmul.f32 %v2900_v0, %v2940_v34 }
 0x196   :  { %v3245_v27 = vadd.f32 %v1316_v49, %v1292_v4  ;;  %1438 = vrot.lane.b32.xlu0 %v976_v14, %s2647_s13  ;;  %1428 = vrot.lane.b32.xlu1 %v3027_v26, %s2647_s13  ;;  %v2490_v26 = vld [vmem:[#allocation5 + $0x10] sm:$0xff] }
 0x198   :  { %v3250_v17 = vpop.permute.xlu0 %1487  ;;  %1256 = vrot.lane.b32.xlu2 %v976_v14, %s2643_s9  ;;  %v3253_v42 = vpop.permute.xlu1 %1242 }
 0x199   :  { %v1266_v6 = vsel %vm1258_vm6, %v3050_v40, %v3253_v42 }
 0x19a   :  { %v1288_v49 = vmul.f32 %v2905_v8, %v1266_v6  ;;  %v3262_v51 = vpop.permute.xlu2 %1341 }
 0x19c   :  { %v3264_v20 = vadd.f32 %v1312_v37, %v1288_v49  ;;  %v2491_v37 = vld [vmem:[#allocation5 + $0x8] sm:$0xff]  ;;  %v1510_v49 = vsel %vm1501_vm5, %v3056_v2, %v3250_v17 }
 0x19e   :  { %1436 = vrot.lane.b32.xlu0 %v972_v61, %s2647_s13  ;;  %1668 = vperm.xlu1 %2487, %v2490_v26  }
 0x1a0   :  { %v3267_v10 = vpop.permute.xlu0 %1560  ;;  %1489 = vrot.lane.b32.xlu2 %v3021_v5, %s2641_s2  ;;  %v3271_v14 = vpop.permute.xlu1 %1147 }
 0x1a1   :  { %v1170_v34 = vsel %vm1161_vm2, %v3103_v13, %v3271_v14 }
 0x1a2   :  { %v1195_v25 = vmul.f32 %v2890_v57, %v1170_v34  ;;  %v3278_v4 = vpop.permute.xlu2 %1149 }
 0x1a3   :  { %v1165_v61 = vsel %vm1161_vm2, %v3105_v48, %v3278_v4 }
 0x1a4   :  { %v3284_v6 = vadd.f32 %v1195_v25, %v1134_v36  ;;  %v1583_v36 = vsel %vm1574_vm7, %v3089_v60, %v3267_v10  ;;  %v1534_v25 = vmul.f32 %v2963_v58, %v1510_v49 }
 0x1a5   :  { %v1607_v2 = vmul.f32 %v2961_v56, %v1583_v36 }
 0x1a6   :  { %1351 = vrot.lane.b32.xlu0 %v3123_v3, %s2646_s12  ;;  %1664 = vperm.xlu1 %2487, %v2491_v37  }
 0x1a8   :  { %v3293_v26 = vpop.permute.xlu0 %1588  ;;  %1343 = vrot.lane.b32.xlu2 %v3048_v52, %s2646_s12  ;;  %v3297_v48 = vpop.permute.xlu1 %1426 }
 0x1a9   :  { %4209 = vst [vmem:[#allocation70_spill] sm:$0xff] %v3293_v26  ;;  %v1449_v34 = vsel %vm1440_vm4, %v3099_v45, %v3297_v48 }
 0x1aa   :  { %v1473_v37 = vmul.f32 %v2915_v15, %v1449_v34  ;;  %v3309_v5 = vpop.permute.xlu2 %1078  ;;  %v2492_v34 = vld [vmem:[#allocation5] sm:$0xff] }
 0x1ab   :  { %v1093_v52 = vsel %vm1088_vm1, %v3133_v21, %v3309_v5 }
 0x1ac   :  { %v1546_v13 = vadd.f32 %v1534_v25, %v1473_v37  ;;  %v1188_v25 = vmul.f32 %v2876_v43, %v1165_v61 }
 0x1ae   :  { %v3316_v60 = vadd.f32 %v1607_v2, %v1546_v13  ;;  %1570 = vrot.lane.b32.xlu0 %v3123_v3, %s2648_s14  ;;  %1499 = vrot.lane.b32.xlu1 %v3135_v50, %s2641_s2  ;;  %v4238_v50 = vld [vmem:[#allocation17_spill] sm:$0xff] }
 0x1b0   :  { %4210 = vst [vmem:[#allocation71_spill] sm:$0xff] %v3316_v60  ;;  %v1014_v49 = vpop.permute.xlu0 %1013  ;;  %1660 = vperm.xlu2 %2488, %v2492_v34   ;;  %v3322_v45 = vpop.permute.xlu1 %1076 }
 0x1b1   :  { %v1031_v26 = vsel %vm1027_vm3, %v3169_v24, %v1014_v49  ;;  %v1092_v2 = vsel %vm1088_vm1, %v3131_v59, %v3322_v45 }
 0x1b2   :  { %v1054_v13 = vmul.f32 %v2898_v63, %v1031_v26  ;;  %v1115_v3 = vmul.f32 %v2881_v47, %v1092_v2  ;;  %v3333_v36 = vpop.permute.xlu2 %1430 }
 0x1b3   :  { %4211 = vst [vmem:[#allocation72_spill] sm:$0xff] %v3333_v36  ;;  %v1445_v24 = vsel %vm1440_vm4, %v3181_v33, %v3333_v36 }
 0x1b4   :  { %v1127_v37 = vadd.f32 %v1115_v3, %v1054_v13  ;;  %v1470_v2 = vmul.f32 %v2931_v28, %v1445_v24 }
 0x1b6   :  { %v3336_v34 = vadd.f32 %v1188_v25, %v1127_v37  ;;  %1497 = vrot.lane.b32.xlu1 %v3118_v53, %s2641_s2 }
 0x1b8   :  { %4212 = vst [vmem:[#allocation73_spill] sm:$0xff] %v3336_v34  ;;  %v3344_v59 = vpop.permute.xlu0 %1246  ;;  %1353 = vrot.lane.b32.xlu2 %v3198_v39, %s2646_s12  ;;  %v3348_v26 = vpop.permute.xlu1 %1491 }
 0x1b9   :  { %4213 = vst [vmem:[#allocation74_spill] sm:$0xff] %v3344_v59  ;;  %v1506_v61 = vsel %vm1501_vm5, %v3219_v62, %v3348_v26 }
 0x1ba   :  { %4214 = vst [vmem:[#allocation75_spill] sm:$0xff] %v3348_v26  ;;  %v1531_v13 = vmul.f32 %v2975_v9, %v1506_v61  ;;  %v3356_v3 = vpop.permute.xlu2 %1493  ;;  %v1119_v61 = vmul.f32 %v2859_v31, %v1093_v52 }
 0x1bb   :  { %4215 = vst [vmem:[#allocation76_spill] sm:$0xff] %v3356_v3 }
 0x1bc   :  { %v3358_v25 = vadd.f32 %v1531_v13, %v1470_v2 }
 0x1be   :  { %1434 = vrot.lane.b32.xlu1 %v3093_v7, %s2647_s13 }
 0x1c0   :  { %v1152_v33 = vpop.permute.xlu0 %1151  ;;  %1572 = vrot.lane.b32.xlu2 %v3198_v39, %s2648_s14  ;;  %v3364_v37 = vpop.permute.xlu1 %1015 }
 0x1c1   :  { %v1166_v62 = vsel %vm1161_vm2, %v3141_v22, %v1152_v33  ;;  %v1032_v24 = vsel %vm1027_vm3, %v3148_v18, %v3364_v37 }
 0x1c2   :  { %v1058_v2 = vmul.f32 %v2865_v35, %v1032_v24  ;;  %v3375_v7 = vpop.permute.xlu2 %1017  ;;  %v1192_v13 = vmul.f32 %v2936_v29, %v1166_v62 }
 0x1c3   :  { %v1033_v39 = vsel %vm1027_vm3, %v3195_v30, %v3375_v7 }
 0x1c4   :  { %v1131_v34 = vadd.f32 %v1119_v61, %v1058_v2 }
 0x1c6   :  { %v3382_v9 = vadd.f32 %v1192_v13, %v1131_v34  ;;  %1349 = vrot.lane.b32.xlu1 %v3158_v38, %s2646_s12  ;;  %v1062_v34 = vmul.f32 %v2852_v23, %v1033_v39 }
 0x1c8   :  { %4216 = vst [vmem:[#allocation77_spill] sm:$0xff] %v3382_v9  ;;  %v1081_v26 = vpop.permute.xlu0 %1080  ;;  %1495 = vrot.lane.b32.xlu2 %v3082_v12, %s2641_s2  ;;  %v3388_v52 = vpop.permute.xlu1 %1248 }
 0x1c9   :  { %4217 = vst [vmem:[#allocation78_spill] sm:$0xff] %v3388_v52  ;;  %v1094_v24 = vsel %vm1088_vm1, %v3216_v54, %v1081_v26  ;;  %v3397_v30 = vsel %vm1258_vm6, %v3253_v42, %v3388_v52 }
 0x1ca   :  { %4218 = vst [vmem:[#allocation79_spill] sm:$0xff] %v3397_v30  ;;  %v1123_v62 = vmul.f32 %v2920_v19, %v1094_v24  ;;  %v3401_v61 = vpop.permute.xlu2 %1250  ;;  %v4247_v30 = vld [vmem:[#allocation36_spill] sm:$0xff] }
 0x1cb   :  { %4219 = vst [vmem:[#allocation80_spill] sm:$0xff] %v3401_v61  ;;  %v3407_v2 = vsel %vm1258_vm6, %v3234_v46, %v3401_v61  ;;  %v4251_v61 = vld [vmem:[#allocation46_spill] sm:$0xff] }
 0x1cc   :  { %4220 = vst [vmem:[#allocation81_spill] sm:$0xff] %v3407_v2  ;;  %v1135_v13 = vadd.f32 %v1123_v62, %v1062_v34  ;;  %v4239_v2 = vld [vmem:[#allocation19_spill] sm:$0xff] }
 0x1d0   :  { %v3409_v54 = vpop.permute.xlu0 %1019  ;;  %1568 = vrot.lane.b32.xlu2 %v3158_v38, %s2648_s14  ;;  %v3413_v42 = vpop.permute.xlu1 %1153  ;;  %v1507_v38 = vsel %vm1501_vm5, %v3250_v17, %v3356_v3 }
 0x1d1   :  { %v1028_v39 = vsel %vm1027_vm3, %v1014_v49, %v3409_v54  ;;  %v1167_v24 = vsel %vm1161_vm2, %v3271_v14, %v3413_v42 }
 0x1d2   :  { %v1196_v46 = vmul.f32 %v2890_v57, %v1167_v24  ;;  %v3423_v12 = vpop.permute.xlu2 %1566 }
 0x1d3   :  { %4221 = vst [vmem:[#allocation82_spill] sm:$0xff] %v3423_v12  ;;  %v1580_v14 = vsel %vm1574_vm7, %v3267_v10, %v3423_v12  ;;  %v1624_v12 = vperm.slane %v2835_v1, 7 }
 0x1d4   :  { %v3425_v34 = vadd.f32 %v1196_v46, %v1135_v13  ;;  %v1535_v13 = vmul.f32 %v2963_v58, %v1507_v38  ;;  %v1608_v36 = vmul.f32 %v2961_v56, %v1580_v14 }
 0x1d6   :  { %4222 = vst [vmem:[#allocation83_spill] sm:$0xff] %v3425_v34 }
 0x1d8   :  { %v3431_v62 = vpop.permute.xlu0 %1252  ;;  %v3433_v28 = vpop.permute.xlu1 %1432 }
 0x1d9   :  { %4223 = vst [vmem:[#allocation84_spill] sm:$0xff] %v3433_v28  ;;  %v3443_v49 = vsel %vm1258_vm6, %v3344_v59, %v3431_v62  ;;  %v1446_v17 = vsel %vm1440_vm4, %v3297_v48, %v3433_v28  ;;  %v4233_v59 = vld [vmem:[#allocation44_spill] sm:$0xff] }
 0x1da   :  { %4224 = vst [vmem:[#allocation85_spill] sm:$0xff] %v3443_v49  ;;  %v1474_v24 = vmul.f32 %v2915_v15, %v1446_v17  ;;  %v3451_v46 = vpop.permute.xlu2 %1155  ;;  %v1211_v49 = vperm.slane %v2835_v1, 6 }
 0x1db   :  { %v1162_v10 = vsel %vm1161_vm2, %v3278_v4, %v3451_v46 }
 0x1dc   :  { %v1547_v3 = vadd.f32 %v1535_v13, %v1474_v24  ;;  %v3472_v14 = vperm.slane %v1211_v49, 2  ;;  %v3474_v13 = vperm.slane %v1624_v12, 3  ;;  %v4226_v24 = vld [vmem:[#allocation51_spill] sm:$0xff] }
 0x1dd   :  { %v4227_v12 = vld [vmem:[#allocation35_spill] sm:$0xff] }
 0x1de   :  { %v1620_v34 = vadd.f32 %v1608_v36, %v1547_v3  ;;  %v1231_v56 = vmul.f32 %v3472_v14, %v3284_v6  ;;  %v4229_v6 = vld [vmem:[#allocation39_spill] sm:$0xff] }
 0x1e0   :  { %v3461_v48 = vpop.permute.xlu0 %1157  ;;  %v3463_v38 = vpop.permute.xlu1 %1347  ;;  %v1644_v58 = vmul.f32 %v3474_v13, %v1620_v34  ;;  %v1055_v34 = vmul.f32 %v2898_v63, %v1028_v39 }
 0x1e1   :  { %4225 = vst [vmem:[#allocation86_spill] sm:$0xff] %v3463_v38  ;;  %v1163_v17 = vsel %vm1161_vm2, %v1152_v33, %v3461_v48  ;;  %v1361_v4 = vsel %vm1355_vm8, %v3262_v51, %v3463_v38  ;;  %v1035_v33 = vsel %vm1027_vm3, %v4226_v24, %v3148_v18 }
 0x1e2   :  { %v1389_v1 = vmul.f32 %v2952_v44, %v1361_v4  ;;  %v1085_v36 = vpop.permute.xlu2 %1084  ;;  %v1096_v4 = vsel %vm1088_vm1, %v4227_v12, %v3133_v21 }
 0x1e3   :  { %v1090_v3 = vsel %vm1088_vm1, %v3309_v5, %v1085_v36  ;;  %v1057_v5 = vmul.f32 %v2865_v35, %v1035_v33  ;;  %v1118_v18 = vmul.f32 %v2859_v31, %v1096_v4  ;;  %v1189_v33 = vmul.f32 %v2876_v43, %v1162_v10 }
 0x1e4   :  { %v1401_v49 = vadd.f32 %v1389_v1, %v3245_v27 }
 0x1e5   :  { %v1130_v1 = vadd.f32 %v1118_v18, %v1057_v5 }
 0x1e6   :  { %v1413_v15 = vadd.f32 %v1401_v49, %v1231_v56  ;;  %v1169_v56 = vsel %vm1161_vm2, %v4229_v6, %v3141_v22  ;;  %v4230_v22 = vld [vmem:[#allocation59_spill] sm:$0xff] }
 0x1e7   :  { %v1191_v18 = vmul.f32 %v2936_v29, %v1169_v56  ;;  %v4240_v56 = vld [vmem:[#allocation25_spill] sm:$0xff] }
 0x1e8   :  { %v3493_v28 = vpop.permute.xlu0 %1086  ;;  %v1083_v38 = vpop.permute.xlu1 %1082  ;;  %v3495_v9 = vadd.f32 %v1644_v58, %v1413_v15 }
 0x1e9   :  { %v1091_v27 = vsel %vm1088_vm1, %v1081_v26, %v3493_v28  ;;  %v1089_v21 = vsel %vm1088_vm1, %v3322_v45, %v1083_v38  ;;  %v1203_v53 = vadd.f32 %v1191_v18, %v1130_v1  ;;  %v4243_v1 = vld [vmem:[#allocation66_spill] sm:$0xff]  ;;  %v4244_v18 = vld [vmem:[#allocation37_spill] sm:$0xff] }
 0x1ea   :  { %4228 = vst [vmem:[#allocation51_spill] sm:$0xff] %v3495_v9  ;;  %v1116_v15 = vmul.f32 %v2881_v47, %v1089_v21  ;;  %v3510_v58 = vpop.permute.xlu2 %1023  ;;  %v1124_v45 = vmul.f32 %v2920_v19, %v1091_v27  ;;  %v4231_v9 = vld [vmem:[#allocation29_spill] sm:$0xff]  ;;  %v4232_v21 = vld [vmem:[#allocation62_spill] sm:$0xff]  ;;  %v4235_v27 = vld [vmem:[#allocation15_spill] sm:$0xff] }
 0x1eb   :  { %v1030_v26 = vsel %vm1027_vm3, %v3375_v7, %v3510_v58  ;;  %v1265_v39 = vsel %vm1258_vm6, %v4231_v9, %v4230_v22  ;;  %v1447_v5 = vsel %vm1440_vm4, %v4233_v59, %v4232_v21  ;;  %v3540_v22 = vmul.f32 %v2938_v32, %v4238_v50  ;;  %v4250_v21 = vld [vmem:[#allocation68_spill] sm:$0xff] }
 0x1ec   :  { %v1128_v49 = vadd.f32 %v1116_v15, %v1055_v34  ;;  %v1063_v4 = vmul.f32 %v2852_v23, %v1030_v26  ;;  %v4236_v34 = vld [vmem:[#allocation21_spill] sm:$0xff]  ;;  %v4237_v26 = vld [vmem:[#allocation16_spill] sm:$0xff]  ;;  %v1120_v50 = vmul.f32 %v2859_v31, %v1090_v3  ;;  %v1582_v60 = vsel %vm1574_vm7, %v4251_v61, %v4250_v21 }
 0x1ed   :  { %v3534_v15 = vmul.f32 %v4236_v34, %v4235_v27  ;;  %v1311_v52 = vmul.f32 %v2900_v0, %v4237_v26  ;;  %v3544_v59 = vmul.f32 %v4236_v34, %v4239_v2  ;;  %v2493_v0 = vld [vmem:[#allocation8] sm:$0xff] }
 0x1ee   :  { %v3528_v7 = vadd.f32 %v1189_v33, %v1128_v49  ;;  %v3530_v10 = vadd.f32 %v1124_v45, %v1063_v4  ;;  %v3547_v33 = vmul.f32 %v4240_v56, %v1265_v39  ;;  %v4241_v45 = vld [vmem:[#allocation24_spill] sm:$0xff]  ;;  %v1099_v4 = vsel %vm1088_vm1, %v1085_v36, %v4227_v12  ;;  %v4245_v12 = vld [vmem:[#allocation30_spill] sm:$0xff] }
 0x1ef   :  { %v3550_v49 = vmul.f32 %v4241_v45, %v1447_v5  ;;  %v1098_v36 = vsel %vm1088_vm1, %v1083_v38, %v4244_v18  ;;  %v1623_v45 = vperm.slane %v2493_v0, 3  ;;  %v4249_v18 = vld [vmem:[#allocation43_spill] sm:$0xff] }
 0x1f0   :  { %4234 = vst [vmem:[#allocation35_spill] sm:$0xff] %v3528_v7  ;;  %v3555_v27 = vpop.permute.xlu0 %1345  ;;  %v1022_v26 = vpop.permute.xlu1 %1021 }
 0x1f1   :  { %4242 = vst [vmem:[#allocation39_spill] sm:$0xff] %v3555_v27  ;;  %v1360_v2 = vsel %vm1355_vm8, %v4243_v1, %v3555_v27  ;;  %v1029_v39 = vsel %vm1027_vm3, %v3364_v37, %v1022_v26  ;;  %v1038_v5 = vsel %vm1027_vm3, %v1022_v26, %v4226_v24  ;;  %v4246_v27 = vld [vmem:[#allocation65_spill] sm:$0xff]  ;;  %v1227_v26 = vmul.f32 %v3472_v14, %v1203_v53 }
 0x1f2   :  { %v1385_v7 = vmul.f32 %v4245_v12, %v1360_v2  ;;  %v1056_v3 = vmul.f32 %v2865_v35, %v1038_v5  ;;  %v1059_v34 = vmul.f32 %v2865_v35, %v1029_v39  ;;  %v3574_v32 = vpop.permute.xlu2 %1256  ;;  %v1508_v37 = vsel %vm1501_vm5, %v4247_v30, %v4246_v27  ;;  %v4248_v24 = vld [vmem:[#allocation41_spill] sm:$0xff] }
 0x1f3   :  { %v1037_v38 = vsel %vm1027_vm3, %v3409_v54, %v4248_v24  ;;  %v1193_v2 = vmul.f32 %v2936_v29, %v1163_v17  ;;  %v1117_v35 = vmul.f32 %v2859_v31, %v1099_v4  ;;  %v1363_v30 = vsel %vm1355_vm8, %v4249_v18, %v4243_v1  ;;  %v4252_v54 = vld [vmem:[#allocation63_spill] sm:$0xff] }
 0x1f4   :  { %v1397_v39 = vadd.f32 %v1385_v7, %v3264_v20  ;;  %v1132_v5 = vadd.f32 %v1120_v50, %v1059_v34  ;;  %v1172_v53 = vsel %vm1161_vm2, %v3461_v48, %v4229_v6  ;;  %v1113_v31 = vmul.f32 %v2881_v47, %v1098_v36  ;;  %v4253_v20 = vld [vmem:[#allocation32_spill] sm:$0xff]  ;;  %v4254_v50 = vld [vmem:[#allocation34_spill] sm:$0xff]  ;;  %v4255_v6 = vld [vmem:[#allocation33_spill] sm:$0xff] }
 0x1f5   :  { %v1362_v17 = vsel %vm1355_vm8, %v4253_v20, %v4252_v54  ;;  %v1129_v34 = vadd.f32 %v1117_v35, %v1056_v3  ;;  %v1526_v1 = vmul.f32 %v4254_v50, %v1508_v37  ;;  %v3608_v24 = vperm.slane %v1623_v45, 3  ;;  %v4256_v36 = vld [vmem:[#allocation40_spill] sm:$0xff] }
 0x1f6   :  { %v1409_v7 = vadd.f32 %v1397_v39, %v1227_v26  ;;  %v3605_v4 = vadd.f32 %v1193_v2, %v1132_v5  ;;  %v1052_v61 = vmul.f32 %v2898_v63, %v1037_v38  ;;  %v1210_v18 = vperm.slane %v2493_v0, 2 }
 0x1f7   :  { %v1384_v48 = vmul.f32 %v4245_v12, %v1363_v30  ;;  %v1603_v47 = vmul.f32 %v4255_v6, %v1582_v60  ;;  %v1171_v20 = vsel %vm1161_vm2, %v3451_v46, %v4256_v36  ;;  %v1190_v3 = vmul.f32 %v2936_v29, %v1172_v53  ;;  %v4257_v30 = vld [vmem:[#allocation55_spill] sm:$0xff] }
 0x1f8   :  { %v3618_v26 = vpop.permute.xlu0 %1564  ;;  %v3620_v2 = vpop.permute.xlu1 %1254  ;;  %v1268_v63 = vsel %vm1258_vm6, %v3431_v62, %v4231_v9  ;;  %v1125_v0 = vadd.f32 %v1113_v31, %v1052_v61  ;;  %v1039_v46 = vsel %vm1027_vm3, %v3510_v58, %v4257_v30  ;;  %v1218_v38 = vperm.slane %v1210_v18, 2  ;;  %v4258_v58 = vld [vmem:[#allocation54_spill] sm:$0xff] }
 0x1f9   :  { %v1579_v60 = vsel %vm1574_vm7, %v4250_v21, %v3618_v26  ;;  %v1269_v29 = vsel %vm1258_vm6, %v3620_v2, %v3050_v40  ;;  %v1202_v45 = vadd.f32 %v1190_v3, %v1129_v34  ;;  %v1615_v62 = vadd.f32 %v1603_v47, %v3240_v11  ;;  %v4259_v31 = vld [vmem:[#allocation26_spill] sm:$0xff]  ;;  %v4260_v34 = vld [vmem:[#allocation69_spill] sm:$0xff] }
 0x1fa   :  { %v1604_v37 = vmul.f32 %v4255_v6, %v1579_v60  ;;  %v1287_v9 = vmul.f32 %v2905_v8, %v1269_v29  ;;  %v3640_v61 = vpop.permute.xlu2 %1489  ;;  %v1186_v21 = vmul.f32 %v2876_v43, %v1171_v20  ;;  %v1270_v40 = vsel %vm1258_vm6, %v3574_v32, %v3072_v16  ;;  %v4261_v43 = vld [vmem:[#allocation45_spill] sm:$0xff]  ;;  %v4263_v29 = vld [vmem:[#allocation60_spill] sm:$0xff] }
 0x1fb   :  { %v1283_v35 = vmul.f32 %v4240_v56, %v1268_v63  ;;  %v1100_v39 = vsel %vm1088_vm1, %v3493_v28, %v4258_v58  ;;  %v1380_v11 = vmul.f32 %v4259_v31, %v1362_v17  ;;  %v1581_v18 = vsel %vm1574_vm7, %v4261_v43, %v4260_v34 }
 0x1fc   :  { %v1616_v5 = vadd.f32 %v1604_v37, %v3358_v25  ;;  %v1323_v53 = vadd.f32 %v1311_v52, %v1287_v9  ;;  %v1198_v20 = vadd.f32 %v1186_v21, %v1125_v0  ;;  %v1060_v16 = vmul.f32 %v2852_v23, %v1039_v46  ;;  %v4262_v52 = vld [vmem:[#allocation70_spill] sm:$0xff] }
 0x1fd   :  { %v1226_v47 = vmul.f32 %v1218_v38, %v1202_v45  ;;  %v1291_v36 = vmul.f32 %v2888_v55, %v1270_v40  ;;  %v1538_v28 = vadd.f32 %v1526_v1, %v3550_v49  ;;  %v1639_v25 = vmul.f32 %v3608_v24, %v1615_v62 }
 0x1fe   :  { %v1640_v3 = vmul.f32 %v3474_v13, %v1616_v5  ;;  %v1396_v63 = vadd.f32 %v1384_v48, %v1323_v53  ;;  %v1599_v17 = vmul.f32 %v4262_v52, %v1581_v18  ;;  %v1121_v60 = vmul.f32 %v2920_v19, %v1100_v39  ;;  %v4264_v19 = vld [vmem:[#allocation58_spill] sm:$0xff]  ;;  %v4265_v53 = vld [vmem:[#allocation67_spill] sm:$0xff] }
 0x1ff   :  { %v1364_v0 = vsel %vm1355_vm8, %v4263_v29, %v3262_v51  ;;  %v1319_v23 = vadd.f32 %v3534_v15, %v1283_v35  ;;  %v1222_v49 = vmul.f32 %v1218_v38, %v1198_v20  ;;  %v1327_v51 = vadd.f32 %v3540_v22, %v1291_v36 }
 0x200   :  { %v1408_v30 = vadd.f32 %v1396_v63, %v1226_v47  ;;  %v3671_v46 = vpop.permute.xlu0 %1562  ;;  %v1160_v45 = vpop.permute.xlu1 %1159  ;;  %v3673_v48 = vadd.f32 %v1640_v3, %v1409_v7  ;;  %v1133_v1 = vadd.f32 %v1121_v60, %v1060_v16  ;;  %v1320_v40 = vadd.f32 %v3544_v59, %v3547_v33  ;;  %v4269_v60 = vld [vmem:[#allocation62_spill] sm:$0xff] }
 0x201   :  { %v1164_v37 = vsel %vm1161_vm2, %v3413_v42, %v1160_v45  ;;  %v1173_v9 = vsel %vm1161_vm2, %v1160_v45, %v4264_v19  ;;  %v1388_v35 = vmul.f32 %v2952_v44, %v1364_v0  ;;  %v1611_v42 = vadd.f32 %v1599_v17, %v1538_v28  ;;  %v4268_v17 = vld [vmem:[#allocation80_spill] sm:$0xff]  ;;  %v4272_v19 = vld [vmem:[#allocation47_spill] sm:$0xff] }
 0x202   :  { %v1194_v15 = vmul.f32 %v2890_v57, %v1173_v9  ;;  %v1197_v62 = vmul.f32 %v2890_v57, %v1164_v37  ;;  %v3684_v21 = vpop.permute.xlu2 %1343  ;;  %v3686_v7 = vadd.f32 %v1639_v25, %v1408_v30  ;;  %v1392_v22 = vadd.f32 %v1380_v11, %v1319_v23  ;;  %v4266_v11 = vld [vmem:[#allocation71_spill] sm:$0xff]  ;;  %v4270_v30 = vld [vmem:[#allocation24_spill] sm:$0xff] }
 0x203   :  { %v1359_v58 = vsel %vm1355_vm8, %v4252_v54, %v3684_v21  ;;  %v1223_v18 = vmul.f32 %v3472_v14, %v4265_v53  ;;  %v1400_v20 = vadd.f32 %v1388_v35, %v1327_v51  ;;  %v1505_v47 = vsel %vm1501_vm5, %v4246_v27, %v3640_v61  ;;  %v3712_v14 = vld [vmem:[#allocation7] sm:$0xff]  ;;  %v4274_v51 = vld [vmem:[#allocation79_spill] sm:$0xff] }
 0x204   :  { %v1206_v39 = vadd.f32 %v1194_v15, %v1133_v1  ;;  %v3696_v5 = vadd.f32 %v1197_v62, %v3530_v10  ;;  %v1381_v57 = vmul.f32 %v4259_v31, %v1359_v58  ;;  %v1404_v16 = vadd.f32 %v1392_v22, %v1222_v49 }
 0x205   :  { %v1635_v54 = vmul.f32 %v3608_v24, %v1611_v42  ;;  %v1643_v10 = vmul.f32 %v3608_v24, %v4266_v11  ;;  %v1261_v27 = vsel %vm1258_vm6, %v4268_v17, %v3574_v32  ;;  %v1578_v24 = vsel %vm1574_vm7, %v4260_v34, %v3671_v46  ;;  %v4273_v32 = vld [vmem:[#allocation18_spill] sm:$0xff]  ;;  %v4275_v34 = vld [vmem:[#allocation81_spill] sm:$0xff] }
 0x206   :  { %v1230_v59 = vmul.f32 %v1218_v38, %v1206_v39  ;;  %v1393_v33 = vadd.f32 %v1381_v57, %v1320_v40  ;;  %v4267_v38 = vld [vmem:[#allocation38_spill] sm:$0xff]  ;;  %v1527_v23 = vmul.f32 %v4254_v50, %v1505_v47  ;;  %v1313_v9 = vmul.f32 %v4273_v32, %v4272_v19  ;;  %v4276_v39 = vld [vmem:[#allocation52_spill] sm:$0xff]  ;;  %v4277_v57 = vld [vmem:[#allocation23_spill] sm:$0xff] }
 0x207   :  { %v1212_v25 = vperm.slane %v4267_v38, 2  ;;  %v1647_v1 = vadd.f32 %v1635_v54, %v1404_v16  ;;  %v1289_v15 = vmul.f32 %v2905_v8, %v4274_v51  ;;  %v1293_v62 = vmul.f32 %v2888_v55, %v4275_v34  ;;  %v4280_v16 = vld [vmem:[#allocation64_spill] sm:$0xff]  ;;  %v4281_v54 = vld [vmem:[#allocation78_spill] sm:$0xff] }
 0x208   :  { %v1412_v36 = vadd.f32 %v1400_v20, %v1230_v59  ;;  %v1405_v3 = vadd.f32 %v1393_v33, %v1223_v18  ;;  %v3708_v63 = vpop.permute.xlu0 %1438  ;;  %v3710_v28 = vpop.permute.xlu1 %1428  ;;  %v1713_v40 = vsel %vm1712_vm9, %v3712_v14, 0  ;;  %v1600_v35 = vmul.f32 %v4262_v52, %v1578_v24  ;;  %v4279_v59 = vld [vmem:[#allocation61_spill] sm:$0xff]  ;;  %v4282_v17 = vld [vmem:[#allocation74_spill] sm:$0xff]  ;;  %v4283_v24 = vld [vmem:[#allocation59_spill] sm:$0xff] }
 0x209   :  { %v1444_v0 = vsel %vm1440_vm4, %v4269_v60, %v3710_v28  ;;  %v1213_v42 = vperm.slane %v4267_v38, 6  ;;  %v1317_v53 = vmul.f32 %v4277_v57, %v4276_v39  ;;  %v3743_v18 = vperm.slane %v1212_v25, 2  ;;  %v4284_v60 = vld [vmem:[#allocation77_spill] sm:$0xff] }
 0x20a   :  { %v1466_v45 = vmul.f32 %v4270_v30, %v1444_v0  ;;  %v3729_v49 = vpop.permute.xlu2 %1660  ;;  %v1655_v37 = vadd.f32 %v1643_v10, %v1412_v36  ;;  %v1294_v20 = vmul.f32 %v2888_v55, %v1261_v27  ;;  %v1314_v33 = vmul.f32 %v4273_v32, %v4279_v59 }
 0x20b   :  { %4271 = vst [vmem:[#allocation29_spill] sm:$0xff] %v3729_v49  ;;  %v1671_v22 = vadd.f32 %v3729_v49, %v1647_v1  ;;  %v1318_v47 = vmul.f32 %v4277_v57, %v4280_v16  ;;  %v1260_v11 = vsel %vm1258_vm6, %v4281_v54, %v3620_v2  ;;  %v3754_v36 = vand.u32 4294901760, %v1713_v40 }
 0x20c   :  { %v1539_v58 = vadd.f32 %v1527_v23, %v1466_v45  ;;  %4278 = vst [vmem:[#allocation15_spill] sm:$0xff] %v3743_v18  ;;  %v3760_v25 = vsel %vm1258_vm6, %v4283_v24, %v4282_v17  ;;  %v1325_v55 = vadd.f32 %v1313_v9, %v1289_v15  ;;  %v1329_v27 = vadd.f32 %v1317_v53, %v1293_v62  ;;  %v4285_v23 = vld [vmem:[#allocation83_spill] sm:$0xff] }
 0x20d   :  { %v3764_v0 = vmul.f32 %v3743_v18, %v4284_v60  ;;  %v1232_v45 = vmul.f32 %v3743_v18, %v4285_v23  ;;  %v3768_v1 = vperm.slane %v1213_v42, 2  ;;  %v1683_v19 = vmax.f32 %v1671_v22, 0.0  ;;  %v4287_v62 = vld [vmem:[#allocation51_spill] sm:$0xff] }
 0x20e   :  { %v1612_v10 = vadd.f32 %v1600_v35, %v1539_v58  ;;  %v1330_v34 = vadd.f32 %v1318_v47, %v1294_v20  ;;  %v1290_v9 = vmul.f32 %v2905_v8, %v1260_v11  ;;  %v3783_v22 = vsub.f32 %v1713_v40, %v3754_v36  ;;  %v4288_v20 = vld [vmem:[#allocation86_spill] sm:$0xff] }
 0x20f   :  { %4286 = vst [vmem:[#allocation16_spill] sm:$0xff] %v3768_v1  ;;  %v1229_v42 = vmul.f32 %v3768_v1, %v3605_v4  ;;  %v1695_v59 = vmin.f32 %v1683_v19, 6.0  ;;  %v1626_v11 = vperm.slane %v4267_v38, 7 }
 0x210   :  { %v1636_v2 = vmul.f32 %v3474_v13, %v1612_v10  ;;  %v3771_v32 = vpop.permute.xlu0 %1436  ;;  %v3773_v51 = vpop.permute.xlu1 %1668  ;;  %v1625_v13 = vperm.slane %v4267_v38, 3  ;;  %v1326_v47 = vadd.f32 %v1314_v33, %v1290_v9  ;;  %v1233_v10 = vmul.f32 %v3768_v1, %v3696_v5 }
 0x211   :  { %v1679_v15 = vadd.f32 %v3773_v51, %v1655_v37  ;;  %v1680_v35 = vadd.f32 %v3773_v51, %v4287_v62  ;;  %v3804_v19 = vand.u32 4294901760, %v3783_v22  ;;  %v3812_v5 = vand.u32 4294901760, %v1695_v59 }
 0x212   :  { %v1648_v58 = vadd.f32 %v1636_v2, %v1405_v3  ;;  %v1354_v39 = vpop.permute.xlu2 %1353  ;;  %v3801_v2 = vperm.slane %v1625_v13, 3 }
 0x213   :  { %v1691_v57 = vmax.f32 %v1679_v15, 0.0  ;;  %v1692_v53 = vmax.f32 %v1680_v35, 0.0  ;;  %v1358_v8 = vsel %vm1355_vm8, %v4288_v20, %v1354_v39  ;;  %v1367_v37 = vsel %vm1355_vm8, %v1354_v39, %v4263_v29  ;;  %v4290_v35 = vld [vmem:[#allocation43_spill] sm:$0xff]  ;;  %v4291_v20 = vld [vmem:[#allocation84_spill] sm:$0xff] }
 0x214   :  { %v1672_v3 = vadd.f32 %v3729_v49, %v1648_v58  ;;  %v1390_v4 = vmul.f32 %v2952_v44, %v1358_v8  ;;  %v1391_v16 = vmul.f32 %v2952_v44, %v1367_v37  ;;  %v1443_v8 = vsel %vm1440_vm4, %v4291_v20, %v3708_v63  ;;  %v4292_v37 = vld [vmem:[#allocation57_spill] sm:$0xff]  ;;  %v4296_v20 = vld [vmem:[#allocation76_spill] sm:$0xff]  ;;  %v4302_v49 = vld [vmem:[#allocation22_spill] sm:$0xff] }
 0x215   :  { %v1703_v40 = vmin.f32 %v1691_v57, 6.0  ;;  %v1704_v54 = vmin.f32 %v1692_v53, 6.0 }
 0x216   :  { %v1684_v17 = vmax.f32 %v1672_v3, 0.0  ;;  %v1402_v24 = vadd.f32 %v1390_v4, %v1329_v27  ;;  %v1403_v60 = vadd.f32 %v1391_v16, %v1330_v34  ;;  %v4289_v34 = vld [vmem:[#allocation39_spill] sm:$0xff] }
 0x217   :  { %v3797_v23 = vand.u32 4294901760, %v1704_v54  ;;  %v3799_v29 = vand.u32 4294901760, %v1703_v40 }
 0x218   :  { %v1696_v44 = vmin.f32 %v1684_v17, 6.0  ;;  %v3806_v33 = vadd.f32 %v1402_v24, %v1232_v45  ;;  %v3808_v9 = vadd.f32 %v1403_v60, %v1233_v10  ;;  %v1352_v38 = vpop.permute.xlu0 %1351  ;;  %v3810_v15 = vpop.permute.xlu1 %1664  ;;  %v3843_v17 = vperm.slane %v1626_v11, 3 }
 0x219   :  { %v3815_v27 = vsub.f32 %v1704_v54, %v3797_v23  ;;  %v1357_v62 = vsel %vm1355_vm8, %v4289_v34, %v1352_v38  ;;  %v1366_v58 = vsel %vm1355_vm8, %v1352_v38, %v4290_v35  ;;  %v1675_v45 = vadd.f32 %v3810_v15, %v3686_v7  ;;  %1729 = vmatpush.msra.mxu0 %v3799_v29 }
 0x21a   :  { %v1386_v39 = vmul.f32 %v4245_v12, %v1357_v62  ;;  %v1387_v13 = vmul.f32 %v4245_v12, %v1366_v58  ;;  %v1676_v57 = vadd.f32 %v3810_v15, %v3673_v48  ;;  %1821 = vmatpush.msra.mxu3 %v3799_v29  ;;  %v1757_v53 = vsub.f32 %v1703_v40, %v3799_v29  ;;  %v1573_v54 = vpop.permute.xlu2 %1572 }
 0x21b   :  { %v1452_v7 = vsel %vm1440_vm4, %v3708_v63, %v4292_v37  ;;  %v1687_v3 = vmax.f32 %v1675_v45, 0.0  ;;  %v1737_v12 = vsub.f32 %v3783_v22, %v3804_v19  ;;  %v4149_v40 = vand.u32 4294901760, %v3815_v27  ;;  %v4294_v45 = vld [vmem:[#allocation82_spill] sm:$0xff] }
 0x21c   :  { %v1398_v4 = vadd.f32 %v1386_v39, %v1325_v55  ;;  %v1399_v48 = vadd.f32 %v1387_v13, %v1326_v47  ;;  %v1688_v16 = vmax.f32 %v1676_v57, 0.0  ;;  %1794 = vmatpush.msra.mxu2 %v1757_v53  ;;  %v1758_v24 = vand.u32 4294901760, %v1757_v53  ;;  %v4293_v47 = vld [vmem:[#allocation20_spill] sm:$0xff] }
 0x21d   :  { %v1699_v10 = vmin.f32 %v1687_v3, 6.0  ;;  %v3846_v60 = vsub.f32 %v1695_v59, %v3812_v5  ;;  %v3853_v55 = vand.u32 4294901760, %v1696_v44  ;;  %v1475_v62 = vmul.f32 %v4293_v47, %v1443_v8  ;;  %v4295_v39 = vld [vmem:[#allocation56_spill] sm:$0xff] }
 0x21e   :  { %v3849_v63 = vadd.f32 %v1398_v4, %v3764_v0  ;;  %v3851_v38 = vadd.f32 %v1399_v48, %v1229_v42  ;;  %v1700_v34 = vmin.f32 %v1688_v16, 6.0  ;;  %v1476_v35 = vmul.f32 %v4293_v47, %v1452_v7  ;;  %v4298_v4 = vld [vmem:[#allocation72_spill] sm:$0xff] }
 0x21f   :  { %v3857_v58 = vand.u32 4294901760, %v1699_v10  ;;  %v1759_v11 = vsub.f32 %v1757_v53, %v1758_v24  ;;  %v1577_v59 = vsel %vm1574_vm7, %v4294_v45, %v1573_v54  ;;  %v1586_v0 = vsel %vm1574_vm7, %v1573_v54, %v4295_v39  ;;  %v4297_v53 = vld [vmem:[#allocation49_spill] sm:$0xff]  ;;  %v4299_v48 = vld [vmem:[#allocation28_spill] sm:$0xff]  ;;  %v4300_v45 = vld [vmem:[#allocation50_spill] sm:$0xff] }
 0x220   :  { %v1500_v42 = vpop.permute.xlu1 %1499  ;;  %v1931_v13 = vsub.f32 %v3815_v27, %v4149_v40  ;;  %v3868_v57 = vand.u32 4294901760, %v1737_v12  ;;  %v3877_v7 = vand.u32 4294901760, %v1700_v34  ;;  %v3880_v3 = vsub.f32 %v1696_v44, %v3853_v55  ;;  %v4301_v44 = vld [vmem:[#allocation27_spill] sm:$0xff] }
 0x221   :  { %v1504_v8 = vsel %vm1501_vm5, %v4296_v20, %v1500_v42  ;;  %v1513_v37 = vsel %vm1501_vm5, %v1500_v42, %v4297_v53  ;;  %1731 = vmatpush.msra.mxu0 %v3857_v58  ;;  %v1442_v12 = vsel %vm1440_vm4, %v4298_v4, %v3771_v32  ;;  %1823 = vmatpush.msra.mxu3 %v3857_v58  ;;  %v1770_v47 = vand.u32 4294901760, %v3846_v60  ;;  %v1571_v4 = vpop.permute.xlu0 %1570 }
 0x222   :  { %v1536_v16 = vmul.f32 %v4299_v48, %v1504_v8  ;;  %v1537_v54 = vmul.f32 %v4299_v48, %v1513_v37  ;;  %v1451_v39 = vsel %vm1440_vm4, %v3771_v32, %v4300_v45  ;;  %v1609_v42 = vmul.f32 %v4301_v44, %v1577_v59  ;;  %v1496_v18 = vpop.permute.xlu2 %1495 }
 0x223   :  { %v1760_v20 = vand.u32 4294901760, %v1759_v11  ;;  %1733 = vmatpush.msra.mxu0 %v3812_v5  ;;  %v1763_v53 = vsub.f32 %v1699_v10, %v3857_v58  ;;  %v1610_v8 = vmul.f32 %v4301_v44, %v1586_v0  ;;  %1825 = vmatpush.msra.mxu3 %v3812_v5  ;;  %v1932_v40 = vand.u32 4294901760, %v1931_v13  ;;  %v4303_v0 = vld [vmem:[#allocation46_spill] sm:$0xff]  ;;  %v4305_v44 = vld [vmem:[#allocation48_spill] sm:$0xff] }
 0x224   :  { %v1548_v37 = vadd.f32 %v1536_v16, %v1475_v62  ;;  %v1549_v48 = vadd.f32 %v1537_v54, %v1476_v35  ;;  %v1471_v1 = vmul.f32 %v4302_v49, %v1442_v12  ;;  %v3901_v59 = vsub.f32 %v1700_v34, %v3877_v7  ;;  %1739 = vmatmul.f32.vlgmr.msra.gmra.mxu0 %v3868_v57  ;;  %v4304_v54 = vld [vmem:[#allocation75_spill] sm:$0xff] }
 0x225   :  { %1761 = vmatpush.msra.mxu1 %v1760_v20  ;;  %1797 = vmatpush.msra.mxu2 %v1763_v53  ;;  %v1764_v32 = vand.u32 4294901760, %v1763_v53  ;;  %v1942_v11 = vand.u32 4294901760, %v3880_v3  ;;  %v1771_v62 = vsub.f32 %v3846_v60, %v1770_v47  ;;  %v1576_v35 = vsel %vm1574_vm7, %v3618_v26, %v1571_v4 }
 0x226   :  { %v1621_v45 = vadd.f32 %v1609_v42, %v1548_v37  ;;  %v1622_v10 = vadd.f32 %v1610_v8, %v1549_v48  ;;  %1849 = vmatpush.msrb.mxu0 %v1758_v24  ;;  %1933 = vmatpush.msrb.mxu3 %v1932_v40  ;;  %v1585_v13 = vsel %vm1574_vm7, %v1571_v4, %v4303_v0  ;;  %v1936_v12 = vand.u32 4294901760, %v3901_v59  ;;  %v4306_v37 = vld [vmem:[#allocation31_spill] sm:$0xff] }
 0x227   :  { %1800 = vmatpush.msra.mxu2 %v3846_v60  ;;  %v1765_v34 = vsub.f32 %v1763_v53, %v1764_v32  ;;  %v1943_v26 = vsub.f32 %v3880_v3, %v1942_v11  ;;  %1829 = vmatmul.f32.vlgmr.msra.gmra.mxu3 %v3804_v19  ;;  %v1772_v0 = vand.u32 4294901760, %v1771_v62  ;;  %v4307_v62 = vld [vmem:[#allocation42_spill] sm:$0xff] }
 0x228   :  { %v1645_v24 = vmul.f32 %v3801_v2, %v1621_v45  ;;  %v1646_v40 = vmul.f32 %v3843_v17, %v1622_v10  ;;  %1853 = vmatpush.msrb.mxu0 %v1764_v32  ;;  %v1498_v16 = vpop.permute.xlu1 %1497  ;;  %v1937_v53 = vsub.f32 %v3901_v59, %v1936_v12  ;;  %1803 = vmatmul.f32.vlgmr.msra.gmra.mxu2 %v3783_v22 }
 0x229   :  { %1901 = vmatpush.msrb.mxu2 %v3797_v23  ;;  %v1503_v60 = vsel %vm1501_vm5, %v4304_v54, %v1498_v16  ;;  %v1512_v42 = vsel %vm1501_vm5, %v1498_v16, %v4305_v44  ;;  %v1766_v20 = vand.u32 4294901760, %v1765_v34  ;;  %v1472_v32 = vmul.f32 %v4302_v49, %v1451_v39  ;;  %v4308_v16 = vld [vmem:[#allocation21_spill] sm:$0xff]  ;;  %v4311_v44 = vld [vmem:[#allocation36_spill] sm:$0xff] }
 0x22a   :  { %v1657_v8 = vadd.f32 %v1645_v24, %v3806_v33  ;;  %v1658_v4 = vadd.f32 %v1646_v40, %v3808_v9  ;;  %1857 = vmatpush.msrb.mxu0 %v1770_v47  ;;  %v1532_v48 = vmul.f32 %v4306_v37, %v1503_v60  ;;  %v1533_v45 = vmul.f32 %v4306_v37, %v1512_v42 }
 0x22b   :  { %1903 = vmatpush.msrb.mxu2 %v3877_v7  ;;  %1767 = vmatpush.msra.mxu1 %v1766_v20  ;;  %v1938_v10 = vand.u32 4294901760, %v1937_v53  ;;  %v1605_v34 = vmul.f32 %v4255_v6, %v1576_v35  ;;  %v1606_v33 = vmul.f32 %v4255_v6, %v1585_v13  ;;  %v1502_v49 = vsel %vm1501_vm5, %v3640_v61, %v1496_v18  ;;  %v4310_v13 = vld [vmem:[#allocation53_spill] sm:$0xff]  ;;  %v1569_v20 = vpop.permute.xlu2 %1568 }
 0x22c   :  { %1966 = vmatpush.msra.mxu0 %v3815_v27  ;;  %v1682_v9 = vadd.f32 %v3773_v51, %v1658_v4  ;;  %v1544_v47 = vadd.f32 %v1532_v48, %v1471_v1  ;;  %v1545_v39 = vadd.f32 %v1533_v45, %v1472_v32  ;;  %v1944_v24 = vand.u32 4294901760, %v1943_v26  ;;  %v4313_v32 = vld [vmem:[#allocation85_spill] sm:$0xff] }
 0x22d   :  { %1905 = vmatpush.msrb.mxu2 %v3853_v55  ;;  %1939 = vmatpush.msrb.mxu3 %v1938_v10  ;;  %v1681_v40 = vadd.f32 %v3773_v51, %v1657_v8  ;;  %v1309_v35 = vmul.f32 %v4308_v16, %v4307_v62  ;;  %v4309_v6 = vand.u32 4294901760, %v3815_v27  ;;  %v1285_v1 = vmul.f32 %v4240_v56, %v3760_v25 }
 0x22e   :  { %1773 = vmatpush.msra.mxu1 %v1772_v0  ;;  %v1617_v54 = vadd.f32 %v1605_v34, %v1544_v47  ;;  %1969 = vmatpush.msra.mxu0 %v3901_v59  ;;  %v1310_v61 = vmul.f32 %v4308_v16, %v4310_v13  ;;  %v1618_v60 = vadd.f32 %v1606_v33, %v1545_v39  ;;  %v1694_v26 = vmax.f32 %v1682_v9, 0.0  ;;  %v4317_v13 = vld [vmem:[#allocation35_spill] sm:$0xff] }
 0x22f   :  { %2021 = vmatpush.msra.mxu2 %v4309_v6  ;;  %1945 = vmatpush.msrb.mxu3 %v1944_v24  ;;  %v1693_v51 = vmax.f32 %v1681_v40, 0.0  ;;  %v1511_v42 = vsel %vm1501_vm5, %v1496_v18, %v4311_v44  ;;  %v1528_v59 = vmul.f32 %v4254_v50, %v1502_v49  ;;  %v4312_v18 = vld [vmem:[#allocation44_spill] sm:$0xff]  ;;  %v1286_v45 = vmul.f32 %v4240_v56, %v4313_v32 }
 0x230   :  { %1877 = vmatpush.msrb.mxu1 %v3799_v29  ;;  %v1641_v27 = vmul.f32 %v3801_v2, %v1617_v54  ;;  %1972 = vmatpush.msra.mxu0 %v3880_v3  ;;  %v1435_v25 = vpop.permute.xlu1 %1434  ;;  %v1642_v53 = vmul.f32 %v3843_v17, %v1618_v60  ;;  %v1575_v10 = vsel %vm1574_vm7, %v3671_v46, %v1569_v20  ;;  %v2650_v24 = vmov 24   ;;  %v4314_v40 = vld [vmem:[#allocation32_spill] sm:$0xff] }
 0x231   :  { %2049 = vmatpush.msra.mxu3 %v3797_v23  ;;  %2025 = vmatpush.msra.mxu2 %v1936_v12  ;;  %v1441_v29 = vsel %vm1440_vm4, %v3710_v28, %v1435_v25  ;;  %v1450_v8 = vsel %vm1440_vm4, %v1435_v25, %v4312_v18  ;;  %v1705_v4 = vmin.f32 %v1693_v51, 6.0  ;;  %v1529_v0 = vmul.f32 %v4254_v50, %v1511_v42 }
 0x232   :  { %1775 = vmatmul.f32.vlgmr.msra.gmra.mxu1 %v3754_v36  ;;  %v1653_v37 = vadd.f32 %v1641_v27, %v3849_v63  ;;  %v1467_v48 = vmul.f32 %v4270_v30, %v1441_v29  ;;  %v1468_v12 = vmul.f32 %v4270_v30, %v1450_v8  ;;  %v1654_v28 = vadd.f32 %v1642_v53, %v3851_v38 }
 0x233   :  { %1879 = vmatpush.msrb.mxu1 %v3857_v58  ;;  %2051 = vmatpush.msra.mxu3 %v3877_v7  ;;  %v3983_v63 = vand.u32 4294901760, %v1705_v4  ;;  %v1706_v58 = vmin.f32 %v1694_v26, 6.0  ;;  %v1584_v46 = vsel %vm1574_vm7, %v1569_v20, %v4261_v43  ;;  %v1321_v34 = vadd.f32 %v1309_v35, %v1285_v1  ;;  %v4316_v1 = vld [vmem:[#allocation15_spill] sm:$0xff] }
 0x234   :  { %2029 = vmatpush.msra.mxu2 %v1942_v11  ;;  %1859 = vmatmul.f32.vlgmr.msrb.gmra.mxu0 %v3754_v36  ;;  %v1540_v56 = vadd.f32 %v1528_v59, %v1467_v48  ;;  %v1677_v30 = vadd.f32 %v3810_v15, %v1653_v37  ;;  %v1678_v50 = vadd.f32 %v3810_v15, %v1654_v28  ;;  %v4319_v48 = vld [vmem:[#allocation29_spill] sm:$0xff] }
 0x235   :  { %1881 = vmatpush.msrb.mxu1 %v3812_v5  ;;  %2053 = vmatpush.msra.mxu3 %v3853_v55  ;;  %v3995_v38 = vsub.f32 %v1705_v4, %v3983_v63  ;;  %v1601_v5 = vmul.f32 %v4262_v52, %v1575_v10  ;;  %v1541_v3 = vadd.f32 %v1529_v0, %v1468_v12  ;;  %v4004_v9 = vand.u32 4294901760, %v1706_v58 }
 0x236   :  { %1911 = vmatmul.f32.vlgmr.msrb.gmra.mxu2 %v3868_v57  ;;  %1947 = vmatmul.f32.vlgmr.msrb.gmra.mxu3 %v3754_v36  ;;  %v1689_v11 = vmax.f32 %v1677_v30, 0.0  ;;  %v1322_v33 = vadd.f32 %v1310_v61, %v1286_v45  ;;  %v1602_v15 = vmul.f32 %v4262_v52, %v1584_v46  ;;  %v4318_v61 = vld [vmem:[#allocation16_spill] sm:$0xff] }
 0x237   :  { %1993 = vmatpush.msra.mxu1 %v3797_v23  ;;  %2073 = vmatpush.msrb.mxu0 %v3983_v63  ;;  %v2102_v43 = vand.u32 4294901760, %v3995_v38  ;;  %v1690_v23 = vmax.f32 %v1678_v50, 0.0  ;;  %v1613_v47 = vadd.f32 %v1601_v5, %v1540_v56  ;;  %v1225_v60 = vmul.f32 %v4318_v61, %v4317_v13 }
 0x238   :  { %2165 = vmatpush.msrb.mxu3 %v3983_v63  ;;  %2138 = vmatpush.msrb.mxu2 %v3995_v38  ;;  %v1350_v49 = vpop.permute.xlu1 %1349  ;;  %v1701_v39 = vmin.f32 %v1689_v11, 6.0  ;;  %v1614_v35 = vadd.f32 %v1602_v15, %v1541_v3  ;;  %v2273_v59 = vsub.f32 %v1706_v58, %v4004_v9 }
 0x239   :  { %1995 = vmatpush.msra.mxu1 %v3877_v7  ;;  %2489 = vset.pattern.permute.xlu0 %v2650_v24  ;;  %v1356_v7 = vsel %vm1355_vm8, %v3684_v21, %v1350_v49  ;;  %v1365_v62 = vsel %vm1355_vm8, %v1350_v49, %v4314_v40  ;;  %v2103_v52 = vsub.f32 %v3995_v38, %v2102_v43  ;;  %v1702_v16 = vmin.f32 %v1690_v23, 6.0  ;;  %v4315_v21 = vld [vmem:[#allocation73_spill] sm:$0xff] }
 0x23a   :  { %1709 = vperm.xlu0 %2489, %v3712_v14   ;;  %1883 = vmatmul.f32.vlgmr.msrb.gmra.mxu1 %v3754_v36  ;;  %v1383_v54 = vmul.f32 %v4259_v31, %v1365_v62  ;;  %v4022_v6 = vand.u32 4294901760, %v1701_v39  ;;  %v1224_v41 = vmul.f32 %v4316_v1, %v4315_v21  ;;  %v1637_v42 = vmul.f32 %v3801_v2, %v1613_v47 }
 0x23b   :  { %1997 = vmatpush.msra.mxu1 %v3853_v55  ;;  %v1382_v55 = vmul.f32 %v4259_v31, %v1356_v7  ;;  %v2104_v51 = vand.u32 4294901760, %v2103_v52  ;;  %v4032_v31 = vand.u32 4294901760, %v1702_v16  ;;  %v1638_v27 = vmul.f32 %v3843_v17, %v1614_v35 }
 0x23c   :  { %1975 = vmatmul.f32.vlgmr.msra.gmra.mxu0 %v3783_v22  ;;  %v1395_v26 = vadd.f32 %v1383_v54, %v1322_v33  ;;  %2167 = vmatpush.msrb.mxu3 %v4022_v6  ;;  %v2107_v44 = vsub.f32 %v1701_v39, %v4022_v6  ;;  %v2274_v37 = vand.u32 4294901760, %v2273_v59 }
 0x23d   :  { %v1394_v14 = vadd.f32 %v1382_v55, %v1321_v34  ;;  %2075 = vmatpush.msrb.mxu0 %v4022_v6  ;;  %2105 = vmatpush.msrb.mxu1 %v2104_v51  ;;  %v2279_v4 = vsub.f32 %v1702_v16, %v4032_v31  ;;  %v2494_v51 = vld [vmem:[#allocation2 + $0x8] sm:$0xff] }
 0x23e   :  { %2031 = vmatmul.f32.vlgmr.msra.gmra.mxu2 %v3754_v36  ;;  %v1407_v25 = vadd.f32 %v1395_v26, %v1225_v60  ;;  %2055 = vmatmul.f32.vlgmr.msra.gmra.mxu3 %v3754_v36  ;;  %v2108_v53 = vand.u32 4294901760, %v2107_v44  ;;  %v2275_v10 = vsub.f32 %v2273_v59, %v2274_v37  ;;  %v2495_v26 = vld [vmem:[#allocation2] sm:$0xff] }
 0x23f   :  { %v1406_v20 = vadd.f32 %v1394_v14, %v1224_v41  ;;  %2141 = vmatpush.msrb.mxu2 %v2107_v44  ;;  %v2280_v45 = vand.u32 4294901760, %v2279_v4 }
 0x240   :  { %v1650_v18 = vadd.f32 %v1638_v27, %v1407_v25  ;;  %v2109_v8 = vsub.f32 %v2107_v44, %v2108_v53  ;;  %v2276_v50 = vand.u32 4294901760, %v2275_v10 }
 0x241   :  { %v1649_v29 = vadd.f32 %v1637_v42, %v1406_v20  ;;  %v2281_v30 = vsub.f32 %v2279_v4, %v2280_v45 }
 0x242   :  { %2001 = vmatmul.f32.vlgmr.msra.gmra.mxu1 %v3804_v19  ;;  %v2110_v2 = vand.u32 4294901760, %v2109_v8  ;;  %v1674_v32 = vadd.f32 %v4319_v48, %v1650_v18 }
 0x243   :  { %v1673_v12 = vadd.f32 %v4319_v48, %v1649_v29  ;;  %v2282_v11 = vand.u32 4294901760, %v2281_v30 }
 0x244   :  { %2111 = vmatpush.msrb.mxu1 %v2110_v2  ;;  %v1686_v28 = vmax.f32 %v1674_v32, 0.0 }
 0x245   :  { %v1685_v17 = vmax.f32 %v1673_v12, 0.0 }
 0x246   :  { %v1698_v0 = vmin.f32 %v1686_v28, 6.0 }
 0x247   :  { %v1697_v58 = vmin.f32 %v1685_v17, 6.0 }
 0x248   :  { %v2248_v46 = vand.u32 4294901760, %v1698_v0 }
 0x249   :  { %v2076_v56 = vand.u32 4294901760, %v1697_v58 }
 0x24a   :  { %v2285_v3 = vsub.f32 %v1698_v0, %v2248_v46 }
 0x24b   :  { %2077 = vmatpush.msrb.mxu0 %v2076_v56  ;;  %2169 = vmatpush.msrb.mxu3 %v2076_v56  ;;  %v2113_v5 = vsub.f32 %v1697_v58, %v2076_v56 }
 0x24c   :  { %2083 = vmatmul.f32.vlgmr.msrb.gmra.mxu0 %v3868_v57  ;;  %v2286_v33 = vand.u32 4294901760, %v2285_v3  ;;  %2173 = vmatmul.f32.vlgmr.msrb.gmra.mxu3 %v3804_v19 }
 0x24d   :  { %2193 = vmatpush.msra.mxu0 %v2102_v43  ;;  %2277 = vmatpush.msra.mxu3 %v2276_v50  ;;  %v2114_v34 = vand.u32 4294901760, %v2113_v5 }
 0x24e   :  { %2144 = vmatpush.msrb.mxu2 %v2113_v5  ;;  %v2287_v15 = vsub.f32 %v2285_v3, %v2286_v33 }
 0x24f   :  { %2197 = vmatpush.msra.mxu0 %v2108_v53  ;;  %2283 = vmatpush.msra.mxu3 %v2282_v11  ;;  %v2115_v23 = vsub.f32 %v2113_v5, %v2114_v34  ;;  %v2496_v5 = vld [vmem:[#allocation2 + $0x18] sm:$0xff]  ;;  %v2497_v11 = vld [vmem:[#allocation2 + $0x10] sm:$0xff] }
 0x250   :  { %2245 = vmatpush.msra.mxu2 %v4004_v9  ;;  %v2288_v43 = vand.u32 4294901760, %v2287_v15 }
 0x251   :  { %2147 = vmatmul.f32.vlgmr.msrb.gmra.mxu2 %v3783_v22  ;;  %2201 = vmatpush.msra.mxu0 %v2114_v34  ;;  %v2116_v38 = vand.u32 4294901760, %v2115_v23 }
 0x252   :  { %2247 = vmatpush.msra.mxu2 %v4032_v31  ;;  %2289 = vmatpush.msra.mxu3 %v2288_v43 }
 0x253   :  { %2310 = vmatpush.msrb.mxu0 %v2273_v59  ;;  %2117 = vmatpush.msrb.mxu1 %v2116_v38 }
 0x254   :  { %2249 = vmatpush.msra.mxu2 %v2248_v46  ;;  %2119 = vmatmul.f32.vlgmr.msrb.gmra.mxu1 %v3754_v36 }
 0x255   :  { %2313 = vmatpush.msrb.mxu0 %v2279_v4  ;;  %2393 = vmatpush.msrb.mxu3 %v4004_v9 }
 0x256   :  { %2365 = vmatpush.msrb.mxu2 %v2274_v37  ;;  %2221 = vmatpush.msra.mxu1 %v3983_v63 }
 0x257   :  { %2316 = vmatpush.msrb.mxu0 %v2285_v3  ;;  %2395 = vmatpush.msrb.mxu3 %v4032_v31 }
 0x258   :  { %2369 = vmatpush.msrb.mxu2 %v2280_v45  ;;  %2223 = vmatpush.msra.mxu1 %v4022_v6 }
 0x259   :  { %2255 = vmatmul.f32.vlgmr.msra.gmra.mxu2 %v3868_v57  ;;  %2397 = vmatpush.msrb.mxu3 %v2248_v46 }
 0x25a   :  { %2373 = vmatpush.msrb.mxu2 %v2286_v33  ;;  %2225 = vmatpush.msra.mxu1 %v2076_v56 }
 0x25b   :  { %2203 = vmatmul.f32.vlgmr.msra.gmra.mxu0 %v3754_v36  ;;  %2291 = vmatmul.f32.vlgmr.msra.gmra.mxu3 %v3754_v36 }
 0x25c   :  { %2337 = vmatpush.msrb.mxu1 %v4004_v9 }
 0x25d   :  { %2227 = vmatmul.f32.vlgmr.msra.gmra.mxu1 %v3754_v36 }
 0x25e   :  { %2339 = vmatpush.msrb.mxu1 %v4032_v31 }
 0x260   :  { %2341 = vmatpush.msrb.mxu1 %v2248_v46 }
 0x261   :  { %2375 = vmatmul.f32.vlgmr.msrb.gmra.mxu2 %v3754_v36 }
 0x263   :  { %2319 = vmatmul.f32.vlgmr.msrb.gmra.mxu0 %v3783_v22  ;;  %2399 = vmatmul.f32.vlgmr.msrb.gmra.mxu3 %v3754_v36 }
 0x265   :  { %2345 = vmatmul.f32.vlgmr.msrb.gmra.mxu1 %v3804_v19 }
 0x2a1   :  { %v1740_v57 = vpop.f32.mrf.mxu0 }
 0x2aa   :  { %v1830_v39 = vpop.f32.mrf.mxu3 }
 0x2ab   :  { %v1804_v49 = vpop.f32.mrf.mxu2 }
 0x2ac   :  { %v1710_v63 = vpop.permute.xlu0 %1709 }
 0x2ad   :  { %v1741_v9 = vadd.f32 %v1740_v57, %v1710_v63 }
 0x2af   :  { %v1776_v47 = vpop.f32.mrf.mxu1 }
 0x2b0   :  { %v1777_v7 = vadd.f32 %v1776_v47, %v1741_v9 }
 0x2b1   :  { %v1860_v24 = vpop.f32.mrf.mxu0 }
 0x2b2   :  { %v1805_v40 = vadd.f32 %v1804_v49, %v1777_v7 }
 0x2b4   :  { %v1831_v55 = vadd.f32 %v1830_v39, %v1805_v40 }
 0x2b6   :  { %v1861_v36 = vadd.f32 %v1860_v24, %v1831_v55 }
 0x2b7   :  { %v1884_v62 = vpop.f32.mrf.mxu1 }
 0x2b8   :  { %v1885_v61 = vadd.f32 %v1884_v62, %v1861_v36 }
 0x2b9   :  { %v1912_v52 = vpop.f32.mrf.mxu2  ;;  %v1948_v35 = vpop.f32.mrf.mxu3 }
 0x2ba   :  { %v1913_v16 = vadd.f32 %v1912_v52, %v1710_v63  ;;  %v1976_v54 = vpop.f32.mrf.mxu0  ;;  %v2403_v44 = vadd.f32 %v2495_v26, %v1885_v61 }
 0x2bc   :  { %v1949_v22 = vadd.f32 %v1948_v35, %v1913_v16 }
 0x2be   :  { %v1977_v6 = vadd.f32 %v1976_v54, %v1949_v22 }
 0x2bf   :  { %v2002_v21 = vpop.f32.mrf.mxu1 }
 0x2c0   :  { %v2003_v19 = vadd.f32 %v2002_v21, %v1977_v6 }
 0x2c1   :  { %v2032_v1 = vpop.f32.mrf.mxu2  ;;  %v2056_v41 = vpop.f32.mrf.mxu3 }
 0x2c2   :  { %v2033_v13 = vadd.f32 %v2032_v1, %v2003_v19 }
 0x2c4   :  { %v2057_v60 = vadd.f32 %v2056_v41, %v2033_v13 }
 0x2c6   :  { %v2404_v14 = vadd.f32 %v2494_v51, %v2057_v60 }
 0x2c8   :  { %v2411_v31 = vrot.slane %v2404_v14, 4 }
 0x2c9   :  { %v2084_v59 = vpop.f32.mrf.mxu0 }
 0x2ca   :  { %v2414_v42 = vsel %vm2413_vm10, %v2403_v44, %v2411_v31  ;;  %v2085_v25 = vadd.f32 %v2084_v59, %v1710_v63 }
 0x2cb   :  { %2418 = vst [vmem:[#allocation10] sm:$0xff] %v2414_v42 }
 0x2cf   :  { %v2174_v53 = vpop.f32.mrf.mxu3 }
 0x2d1   :  { %v2120_v27 = vpop.f32.mrf.mxu1 }
 0x2d2   :  { %v2121_v18 = vadd.f32 %v2120_v27, %v2085_v25 }
 0x2d4   :  { %v2148_v20 = vpop.f32.mrf.mxu2 }
 0x2d5   :  { %v2149_v37 = vadd.f32 %v2148_v20, %v2121_v18 }
 0x2d7   :  { %v2175_v17 = vadd.f32 %v2174_v53, %v2149_v37 }
 0x2d8   :  { %v2204_v29 = vpop.f32.mrf.mxu0 }
 0x2d9   :  { %v2205_v58 = vadd.f32 %v2204_v29, %v2175_v17 }
 0x2da   :  { %v2228_v8 = vpop.f32.mrf.mxu1 }
 0x2db   :  { %v2229_v46 = vadd.f32 %v2228_v8, %v2205_v58 }
 0x2dc   :  { %v2256_v4 = vpop.f32.mrf.mxu2 }
 0x2dd   :  { %v2257_v2 = vadd.f32 %v2256_v4, %v1710_v63  ;;  %v2405_v34 = vadd.f32 %v2497_v11, %v2229_v46 }
 0x2de   :  { %v2292_v48 = vpop.f32.mrf.mxu3 }
 0x2df   :  { %v2293_v12 = vadd.f32 %v2292_v48, %v2257_v2 }
 0x2e0   :  { %v2320_v32 = vpop.f32.mrf.mxu0 }
 0x2e1   :  { %v2321_v45 = vadd.f32 %v2320_v32, %v2293_v12 }
 0x2e2   :  { %v2346_v28 = vpop.f32.mrf.mxu1 }
 0x2e3   :  { %v2347_v0 = vadd.f32 %v2346_v28, %v2321_v45 }
 0x2e4   :  { %v2376_v10 = vpop.f32.mrf.mxu2 }
 0x2e5   :  { %v2377_v56 = vadd.f32 %v2376_v10, %v2347_v0 }
 0x2e6   :  { %v2400_v30 = vpop.f32.mrf.mxu3 }
 0x2e7   :  { %v2401_v50 = vadd.f32 %v2400_v30, %v2377_v56 }
 0x2e9   :  { %v2406_v3 = vadd.f32 %v2496_v5, %v2401_v50 }
 0x2eb   :  { %v2412_v33 = vrot.slane %v2406_v3, 4 }
 0x2ed   :  { %v2415_v23 = vsel %vm2413_vm10, %v2405_v34, %v2412_v33 }
 0x2ee   :  { %2419 = vst [vmem:[#allocation10 + $0x8] sm:$0xff] %v2415_v23 }
 0x2ef   :  { %2430 = dma.vmem_to_hbm [thread:$0]  %s2426_s16, 256, %s2428_s19, [#allocation4]  }
 0x2f0   :  { %2624 = dma.done.wait [#allocation4], 256  }
 0x2f1   :  { %2625 = vsyncadd [#allocation4], 4294967040 }
 0x2f2   :  { %2435 = vsyncpa [#allocation3], 1 }
 0x2f3   :  { %2436 = vsyncpa [#allocation6], 1 }
 0x2f4   :  { %2437 = vsyncpa [#allocation9], 1 }
 0x2f5   :  { %2438 = vsyncpa [#allocation4], 1 }

</bundles_post_ra>
